<compile_context>
chip_gen: v5e
topology: v5e:2x2
jax: 0.10.0
libtpu: 0.0.40
codegen_flags: <defaults>
</compile_context>

<pallas_src>
import jax
import jax.numpy as jnp
from jax.experimental import pallas as pl
from jax.experimental.pallas import tpu as pltpu

HIDDEN_SHAPE_FIRST = 64
HIDDEN_SHAPE_GRU = 32
HIDDEN_SHAPE_SECOND = 32

GATE_TILE = 128            # each GRU gate is padded to its own 128-lane tile
LANE_W = 3 * GATE_TILE     # packed-slab lane width


def _pad8(n):
    return ((n + 7) // 8) * 8


def _slab_offsets(input_dim):
    """Static row offsets of each packed operand inside the weight slab."""
    o_w1 = 0
    o_b1 = _pad8(input_dim)
    o_wg = o_b1 + 8                      # fused (fc2 . W_ih) weight, 64 rows
    o_bg = o_wg + HIDDEN_SHAPE_FIRST
    o_whh = o_bg + 8                     # padded W_hh, 128 rows
    o_bhn = o_whh + GATE_TILE
    o_wout = o_bhn + 8                   # padded fc2 (output) weight, 128 rows
    o_bout = o_wout + GATE_TILE
    total = o_bout + 8
    return o_w1, o_b1, o_wg, o_bg, o_whh, o_bhn, o_wout, o_bout, total


def fc_gru_kernel(x_ref, slab_ref, out_ref):
    HG, H1, GT = HIDDEN_SHAPE_GRU, HIDDEN_SHAPE_FIRST, GATE_TILE
    rows, din = x_ref.shape
    batch, num_actions = out_ref.shape
    seq_len = rows // batch

    (o_w1, o_b1, o_wg, o_bg, o_whh, o_bhn, o_wout, o_bout, _) = _slab_offsets(din)

    # Static slices into the single packed weight slab (one-time prologue loads).
    w1 = slab_ref[o_w1:o_w1 + din, 0:H1]          # (Din, 64)
    b1 = slab_ref[o_b1:o_b1 + 1, 0:H1]            # (1, 64)
    wg = slab_ref[o_wg:o_wg + H1, :]              # (64, 384)  fused fc2 . W_ih (gate-padded)
    bg = slab_ref[o_bg:o_bg + 1, :]               # (1, 384)
    whh = slab_ref[o_whh:o_whh + GT, :]           # (128, 384) gate-padded W_hh
    bhn = slab_ref[o_bhn:o_bhn + 1, 0:GT]         # (1, 128)
    wout = slab_ref[o_wout:o_wout + GT, 0:num_actions]   # (128, A)
    bout = slab_ref[o_bout:o_bout + 1, 0:num_actions]    # (1, A)

    # ---- Prologue: everything that does not depend on h, batched over S*B rows.
    h1 = jnp.maximum(
        jnp.dot(x_ref[...], w1, preferred_element_type=jnp.float32) + b1, 0.0)
    # Input-side gate pre-activations for all timesteps, gate-padded:
    #   lanes [0:128)=r, [128:256)=z, [256:384)=n; live data in lanes 0:32 of each tile.
    gi = jnp.dot(h1, wg, preferred_element_type=jnp.float32) + bg    # (S*B, 384)

    # Hoisted (JAX does not CSE broadcast_in_dim inside the unrolled loop).
    bhn_b = jnp.broadcast_to(bhn, (batch, GT))

    # ---- Serial recurrence: only h @ W_hh + gating on the critical path.
    # All slices below are at 128-lane vreg-tile boundaries; h is a full lane tile.
    h = jnp.zeros((batch, GT), jnp.float32)
    for t in range(seq_len):                      # fully unrolled, static slices
        gi_t = gi[t * batch:(t + 1) * batch]      # (B, 384); sublane-aligned if B % 8 == 0
        gh = jnp.dot(h, whh, preferred_element_type=jnp.float32)     # (B, 384)
        rz = jax.nn.sigmoid(gi_t[:, 0:2 * GT] + gh[:, 0:2 * GT])     # one sigmoid for r & z
        r = rz[:, 0:GT]
        z = rz[:, GT:2 * GT]
        n = jnp.tanh(gi_t[:, 2 * GT:] + r * (gh[:, 2 * GT:] + bhn_b))
        h = (1.0 - z) * n + z * h                 # pad lanes stay exactly 0

    # ---- Epilogue: fc2 on the final hidden state (h_n).  Pad rows of wout are 0.
    out_ref[...] = jnp.dot(h, wout, preferred_element_type=jnp.float32) + bout


def fc_gru_forward(x, slab, num_actions):
    """x: (seq, batch, input_dim) float32, equal-length time-major sequences.
    slab: packed weight slab from pack_params().  Returns (batch, num_actions)."""
    S, B, Din = x.shape
    # Note: B should be a multiple of 8 (f32 sublane tile) so the per-timestep
    # row slices of gi are tile-aligned; other sizes are correct but slower.
    x2 = x.reshape(S * B, Din)          # time-major flatten: row t*B+b == x[t, b]

    return pl.pallas_call(
        fc_gru_kernel,
        out_shape=jax.ShapeDtypeStruct((B, num_actions), jnp.float32),
        in_specs=[pl.BlockSpec(memory_space=pltpu.MemorySpace.VMEM),
                  pl.BlockSpec(memory_space=pltpu.MemorySpace.VMEM)],
        out_specs=pl.BlockSpec(memory_space=pltpu.MemorySpace.VMEM),
    )(x2, slab)


def init_params(key, input_shape, num_actions):
    """PyTorch-style uniform init; raw per-layer weights, stored pre-transposed."""
    def uni(k, shape, fan_in):
        bound = 1.0 / jnp.sqrt(jnp.float32(fan_in))
        return jax.random.uniform(k, shape, jnp.float32, -bound, bound)

    ks = jax.random.split(key, 10)
    H1, HG, H2 = HIDDEN_SHAPE_FIRST, HIDDEN_SHAPE_GRU, HIDDEN_SHAPE_SECOND

    # fc: Linear(in, 64) -> ReLU -> Linear(64, 32)
    w1 = uni(ks[0], (H1, input_shape), input_shape)
    b1 = uni(ks[1], (1, H1), input_shape)
    w2 = uni(ks[2], (H2, H1), H1)
    b2 = uni(ks[3], (1, H2), H1)
    # GRU (PyTorch packs gates as [r; z; n] along the output dim)
    wih = uni(ks[4], (3 * HG, H2), HG)
    whh = uni(ks[5], (3 * HG, HG), HG)
    bih = uni(ks[6], (1, 3 * HG), HG)
    bhh = uni(ks[7], (1, 3 * HG), HG)
    # fc2: Linear(32, num_actions)
    wout = uni(ks[8], (num_actions, HG), HG)
    bout = uni(ks[9], (1, num_actions), HG)

    return {
        "w1_t": w1.T, "b1": b1,
        "w2_t": w2.T, "b2": b2,
        "wih_t": wih.T, "bih": bih, "bhh": bhh,
        "whh_t": whh.T,
        "wout_t": wout.T, "bout": bout,
    }


def pack_params(p):
    """Fuse + gate-pad weights and pack them into one 8x128-aligned f32 slab."""
    HG, H1 = HIDDEN_SHAPE_GRU, HIDDEN_SHAPE_FIRST
    GT = GATE_TILE
    input_dim = p["w1_t"].shape[0]
    num_actions = p["wout_t"].shape[1]

    # Fold r/z hidden-side biases into the input-side bias (mathematically
    # identical); keep b_hn separate -- it sits inside r * (W_hn h + b_hn).
    bih_fused = jnp.concatenate(
        [p["bih"][:, 0:HG] + p["bhh"][:, 0:HG],
         p["bih"][:, HG:2 * HG] + p["bhh"][:, HG:2 * HG],
         p["bih"][:, 2 * HG:3 * HG]], axis=1)
    bhn = p["bhh"][:, 2 * HG:3 * HG]

    # Fuse fc second layer with the GRU input projection (single linear map).
    wg = p["w2_t"] @ p["wih_t"]                       # (64, 96)
    bg = p["b2"] @ p["wih_t"] + bih_fused             # (1, 96)

    def pad_gates(m):   # (..., 96) -> (..., 384): each gate at its own 128-lane tile
        out = jnp.zeros(m.shape[:-1] + (LANE_W,), jnp.float32)
        for g in range(3):
            out = out.at[..., g * GT:g * GT + HG].set(m[..., g * HG:(g + 1) * HG])
        return out

    wg_pad = pad_gates(wg)                                             # (64, 384)
    bg_pad = pad_gates(bg)                                             # (1, 384)
    whh_pad = jnp.zeros((GT, LANE_W), jnp.float32).at[:HG].set(pad_gates(p["whh_t"]))
    bhn_pad = jnp.zeros((1, GT), jnp.float32).at[:, :HG].set(bhn)
    wout_pad = jnp.zeros((GT, num_actions), jnp.float32).at[:HG].set(p["wout_t"])

    (o_w1, o_b1, o_wg, o_bg, o_whh, o_bhn, o_wout, o_bout,
     total) = _slab_offsets(input_dim)

    slab = jnp.zeros((total, LANE_W), jnp.float32)
    slab = slab.at[o_w1:o_w1 + input_dim, 0:H1].set(p["w1_t"])
    slab = slab.at[o_b1:o_b1 + 1, 0:H1].set(p["b1"])
    slab = slab.at[o_wg:o_wg + H1, :].set(wg_pad)
    slab = slab.at[o_bg:o_bg + 1, :].set(bg_pad)
    slab = slab.at[o_whh:o_whh + GT, :].set(whh_pad)
    slab = slab.at[o_bhn:o_bhn + 1, 0:GT].set(bhn_pad)
    slab = slab.at[o_wout:o_wout + GT, 0:num_actions].set(wout_pad)
    slab = slab.at[o_bout:o_bout + 1, 0:num_actions].set(p["bout"])
    return slab


def reference_forward(x, p):
    """Pure-JAX reference of the PyTorch forward (equal-length sequences)."""
    S, B, _ = x.shape
    HG = HIDDEN_SHAPE_GRU
    h = jnp.zeros((B, HG), jnp.float32)
    for t in range(S):
        h1 = jnp.maximum(x[t] @ p["w1_t"] + p["b1"], 0.0)
        f = h1 @ p["w2_t"] + p["b2"]
        gi = f @ p["wih_t"] + p["bih"]
        gh = h @ p["whh_t"] + p["bhh"]
        r = jax.nn.sigmoid(gi[:, 0:HG] + gh[:, 0:HG])
        z = jax.nn.sigmoid(gi[:, HG:2 * HG] + gh[:, HG:2 * HG])
        n = jnp.tanh(gi[:, 2 * HG:3 * HG] + r * gh[:, 2 * HG:3 * HG])
        h = (1.0 - z) * n + z * h
    return h @ p["wout_t"] + p["bout"]


if __name__ == "__main__":
    SEQ, BATCH, INPUT_SHAPE, NUM_ACTIONS = 6, 8, 16, 4

    key = jax.random.PRNGKey(0)
    k_x, k_p = jax.random.split(key)
    x = jax.random.normal(k_x, (SEQ, BATCH, INPUT_SHAPE), jnp.float32)
    params = init_params(k_p, INPUT_SHAPE, NUM_ACTIONS)
    slab = pack_params(params)

    out = fc_gru_forward(x, slab, NUM_ACTIONS)
    out = jax.block_until_ready(out)

    ref = reference_forward(x, params)
    assert out.shape == (BATCH, NUM_ACTIONS)
    # Tolerance allows for the (mathematically exact) w2.Wih fusion's rounding.
    assert jnp.allclose(out, ref, atol=1e-4, rtol=1e-4), "mismatch vs JAX reference"

    print("KERNEL_OK")
</pallas_src>

<mosaic_0001>
module attributes {stable_mosaic.version = 11 : i64} {
  func.func @fc_gru_kernel(%arg0: memref<48x16xf32, #tpu.memory_space<vmem>>, %arg1: memref<368x384xf32, #tpu.memory_space<vmem>>, %arg2: memref<8x4xf32, #tpu.memory_space<vmem>>) attributes {dimension_semantics = [], scalar_prefetch = 0 : i64, scratch_operands = 0 : i64, tpu.core_type = #tpu.core_type<tc>} {
    %c0 = arith.constant 0 : index
    %c0_0 = arith.constant 0 : index
    %0 = vector.load %arg1[%c0, %c0_0] : memref<368x384xf32, #tpu.memory_space<vmem>>, vector<16x64xf32>
    %c16 = arith.constant 16 : index
    %c0_1 = arith.constant 0 : index
    %1 = vector.load %arg1[%c16, %c0_1] : memref<368x384xf32, #tpu.memory_space<vmem>>, vector<1x64xf32>
    %c24 = arith.constant 24 : index
    %c0_2 = arith.constant 0 : index
    %2 = vector.load %arg1[%c24, %c0_2] : memref<368x384xf32, #tpu.memory_space<vmem>>, vector<64x384xf32>
    %c88 = arith.constant 88 : index
    %c0_3 = arith.constant 0 : index
    %3 = vector.load %arg1[%c88, %c0_3] : memref<368x384xf32, #tpu.memory_space<vmem>>, vector<1x384xf32>
    %c96 = arith.constant 96 : index
    %c0_4 = arith.constant 0 : index
    %4 = vector.load %arg1[%c96, %c0_4] : memref<368x384xf32, #tpu.memory_space<vmem>>, vector<128x384xf32>
    %c224 = arith.constant 224 : index
    %c0_5 = arith.constant 0 : index
    %5 = vector.load %arg1[%c224, %c0_5] : memref<368x384xf32, #tpu.memory_space<vmem>>, vector<1x128xf32>
    %c232 = arith.constant 232 : index
    %c0_6 = arith.constant 0 : index
    %6 = vector.load %arg1[%c232, %c0_6] : memref<368x384xf32, #tpu.memory_space<vmem>>, vector<128x4xf32>
    %c360 = arith.constant 360 : index
    %c0_7 = arith.constant 0 : index
    %7 = vector.load %arg1[%c360, %c0_7] : memref<368x384xf32, #tpu.memory_space<vmem>>, vector<1x4xf32>
    %c0_8 = arith.constant 0 : index
    %c0_9 = arith.constant 0 : index
    %8 = vector.load %arg0[%c0_8, %c0_9] : memref<48x16xf32, #tpu.memory_space<vmem>>, vector<48x16xf32>
    %cst = arith.constant dense<0.000000e+00> : vector<48x64xf32>
    %9 = tpu.matmul %8, %0, %cst {dimension_numbers = #tpu.dot_dimension_numbers<[1], [0], [0], [1], [0, 0, 1, 1], [], []>} : vector<48x16xf32>, vector<16x64xf32>, vector<48x64xf32> -> vector<48x64xf32>
    %10 = vector.broadcast %1 : vector<1x64xf32> to vector<48x64xf32>
    %11 = arith.addf %9, %10 : vector<48x64xf32>
    %cst_10 = arith.constant 0.000000e+00 : f32
    %12 = vector.broadcast %cst_10 : f32 to vector<48x64xf32>
    %13 = arith.maximumf %11, %12 : vector<48x64xf32>
    %cst_11 = arith.constant dense<0.000000e+00> : vector<48x384xf32>
    %14 = tpu.matmul %13, %2, %cst_11 {dimension_numbers = #tpu.dot_dimension_numbers<[1], [0], [0], [1], [0, 0, 1, 1], [], []>} : vector<48x64xf32>, vector<64x384xf32>, vector<48x384xf32> -> vector<48x384xf32>
    %15 = vector.broadcast %3 : vector<1x384xf32> to vector<48x384xf32>
    %16 = arith.addf %14, %15 : vector<48x384xf32>
    %17 = vector.shape_cast %5 : vector<1x128xf32> to vector<1x128xf32>
    %18 = vector.broadcast %17 : vector<1x128xf32> to vector<8x128xf32>
    %cst_12 = arith.constant 0.000000e+00 : f32
    %19 = vector.broadcast %cst_12 : f32 to vector<8x128xf32>
    %20 = vector.extract_strided_slice %16 {offsets = [0, 0], sizes = [8, 384], strides = [1, 1]} : vector<48x384xf32> to vector<8x384xf32>
    %cst_13 = arith.constant dense<0.000000e+00> : vector<8x384xf32>
    %21 = tpu.matmul %19, %4, %cst_13 {dimension_numbers = #tpu.dot_dimension_numbers<[1], [0], [0], [1], [0, 0, 1, 1], [], []>} : vector<8x128xf32>, vector<128x384xf32>, vector<8x384xf32> -> vector<8x384xf32>
    %22 = vector.extract_strided_slice %20 {offsets = [0, 0], sizes = [8, 256], strides = [1, 1]} : vector<8x384xf32> to vector<8x256xf32>
    %23 = vector.extract_strided_slice %21 {offsets = [0, 0], sizes = [8, 256], strides = [1, 1]} : vector<8x384xf32> to vector<8x256xf32>
    %24 = arith.addf %22, %23 : vector<8x256xf32>
    %25 = arith.negf %24 : vector<8x256xf32>
    %26 = math.exp %25 : vector<8x256xf32>
    %cst_14 = arith.constant 1.000000e+00 : f32
    %27 = vector.broadcast %cst_14 : f32 to vector<8x256xf32>
    %28 = arith.addf %27, %26 : vector<8x256xf32>
    %29 = arith.divf %27, %28 : vector<8x256xf32>
    %30 = vector.extract_strided_slice %29 {offsets = [0, 0], sizes = [8, 128], strides = [1, 1]} : vector<8x256xf32> to vector<8x128xf32>
    %31 = vector.extract_strided_slice %29 {offsets = [0, 128], sizes = [8, 128], strides = [1, 1]} : vector<8x256xf32> to vector<8x128xf32>
    %32 = vector.extract_strided_slice %20 {offsets = [0, 256], sizes = [8, 128], strides = [1, 1]} : vector<8x384xf32> to vector<8x128xf32>
    %33 = vector.extract_strided_slice %21 {offsets = [0, 256], sizes = [8, 128], strides = [1, 1]} : vector<8x384xf32> to vector<8x128xf32>
    %34 = arith.addf %33, %18 : vector<8x128xf32>
    %35 = arith.mulf %30, %34 : vector<8x128xf32>
    %36 = arith.addf %32, %35 : vector<8x128xf32>
    %37 = math.tanh %36 : vector<8x128xf32>
    %cst_15 = arith.constant 1.000000e+00 : f32
    %38 = vector.broadcast %cst_15 : f32 to vector<8x128xf32>
    %39 = arith.subf %38, %31 : vector<8x128xf32>
    %40 = arith.mulf %39, %37 : vector<8x128xf32>
    %41 = arith.mulf %31, %19 : vector<8x128xf32>
    %42 = arith.addf %40, %41 : vector<8x128xf32>
    %43 = vector.extract_strided_slice %16 {offsets = [8, 0], sizes = [8, 384], strides = [1, 1]} : vector<48x384xf32> to vector<8x384xf32>
    %cst_16 = arith.constant dense<0.000000e+00> : vector<8x384xf32>
    %44 = tpu.matmul %42, %4, %cst_16 {dimension_numbers = #tpu.dot_dimension_numbers<[1], [0], [0], [1], [0, 0, 1, 1], [], []>} : vector<8x128xf32>, vector<128x384xf32>, vector<8x384xf32> -> vector<8x384xf32>
    %45 = vector.extract_strided_slice %43 {offsets = [0, 0], sizes = [8, 256], strides = [1, 1]} : vector<8x384xf32> to vector<8x256xf32>
    %46 = vector.extract_strided_slice %44 {offsets = [0, 0], sizes = [8, 256], strides = [1, 1]} : vector<8x384xf32> to vector<8x256xf32>
    %47 = arith.addf %45, %46 : vector<8x256xf32>
    %48 = arith.negf %47 : vector<8x256xf32>
    %49 = math.exp %48 : vector<8x256xf32>
    %cst_17 = arith.constant 1.000000e+00 : f32
    %50 = vector.broadcast %cst_17 : f32 to vector<8x256xf32>
    %51 = arith.addf %50, %49 : vector<8x256xf32>
    %52 = arith.divf %50, %51 : vector<8x256xf32>
    %53 = vector.extract_strided_slice %52 {offsets = [0, 0], sizes = [8, 128], strides = [1, 1]} : vector<8x256xf32> to vector<8x128xf32>
    %54 = vector.extract_strided_slice %52 {offsets = [0, 128], sizes = [8, 128], strides = [1, 1]} : vector<8x256xf32> to vector<8x128xf32>
    %55 = vector.extract_strided_slice %43 {offsets = [0, 256], sizes = [8, 128], strides = [1, 1]} : vector<8x384xf32> to vector<8x128xf32>
    %56 = vector.extract_strided_slice %44 {offsets = [0, 256], sizes = [8, 128], strides = [1, 1]} : vector<8x384xf32> to vector<8x128xf32>
    %57 = arith.addf %56, %18 : vector<8x128xf32>
    %58 = arith.mulf %53, %57 : vector<8x128xf32>
    %59 = arith.addf %55, %58 : vector<8x128xf32>
    %60 = math.tanh %59 : vector<8x128xf32>
    %cst_18 = arith.constant 1.000000e+00 : f32
    %61 = vector.broadcast %cst_18 : f32 to vector<8x128xf32>
    %62 = arith.subf %61, %54 : vector<8x128xf32>
    %63 = arith.mulf %62, %60 : vector<8x128xf32>
    %64 = arith.mulf %54, %42 : vector<8x128xf32>
    %65 = arith.addf %63, %64 : vector<8x128xf32>
    %66 = vector.extract_strided_slice %16 {offsets = [16, 0], sizes = [8, 384], strides = [1, 1]} : vector<48x384xf32> to vector<8x384xf32>
    %cst_19 = arith.constant dense<0.000000e+00> : vector<8x384xf32>
    %67 = tpu.matmul %65, %4, %cst_19 {dimension_numbers = #tpu.dot_dimension_numbers<[1], [0], [0], [1], [0, 0, 1, 1], [], []>} : vector<8x128xf32>, vector<128x384xf32>, vector<8x384xf32> -> vector<8x384xf32>
    %68 = vector.extract_strided_slice %66 {offsets = [0, 0], sizes = [8, 256], strides = [1, 1]} : vector<8x384xf32> to vector<8x256xf32>
    %69 = vector.extract_strided_slice %67 {offsets = [0, 0], sizes = [8, 256], strides = [1, 1]} : vector<8x384xf32> to vector<8x256xf32>
    %70 = arith.addf %68, %69 : vector<8x256xf32>
    %71 = arith.negf %70 : vector<8x256xf32>
    %72 = math.exp %71 : vector<8x256xf32>
    %cst_20 = arith.constant 1.000000e+00 : f32
    %73 = vector.broadcast %cst_20 : f32 to vector<8x256xf32>
    %74 = arith.addf %73, %72 : vector<8x256xf32>
    %75 = arith.divf %73, %74 : vector<8x256xf32>
    %76 = vector.extract_strided_slice %75 {offsets = [0, 0], sizes = [8, 128], strides = [1, 1]} : vector<8x256xf32> to vector<8x128xf32>
    %77 = vector.extract_strided_slice %75 {offsets = [0, 128], sizes = [8, 128], strides = [1, 1]} : vector<8x256xf32> to vector<8x128xf32>
    %78 = vector.extract_strided_slice %66 {offsets = [0, 256], sizes = [8, 128], strides = [1, 1]} : vector<8x384xf32> to vector<8x128xf32>
    %79 = vector.extract_strided_slice %67 {offsets = [0, 256], sizes = [8, 128], strides = [1, 1]} : vector<8x384xf32> to vector<8x128xf32>
    %80 = arith.addf %79, %18 : vector<8x128xf32>
    %81 = arith.mulf %76, %80 : vector<8x128xf32>
    %82 = arith.addf %78, %81 : vector<8x128xf32>
    %83 = math.tanh %82 : vector<8x128xf32>
    %cst_21 = arith.constant 1.000000e+00 : f32
    %84 = vector.broadcast %cst_21 : f32 to vector<8x128xf32>
    %85 = arith.subf %84, %77 : vector<8x128xf32>
    %86 = arith.mulf %85, %83 : vector<8x128xf32>
    %87 = arith.mulf %77, %65 : vector<8x128xf32>
    %88 = arith.addf %86, %87 : vector<8x128xf32>
    %89 = vector.extract_strided_slice %16 {offsets = [24, 0], sizes = [8, 384], strides = [1, 1]} : vector<48x384xf32> to vector<8x384xf32>
    %cst_22 = arith.constant dense<0.000000e+00> : vector<8x384xf32>
    %90 = tpu.matmul %88, %4, %cst_22 {dimension_numbers = #tpu.dot_dimension_numbers<[1], [0], [0], [1], [0, 0, 1, 1], [], []>} : vector<8x128xf32>, vector<128x384xf32>, vector<8x384xf32> -> vector<8x384xf32>
    %91 = vector.extract_strided_slice %89 {offsets = [0, 0], sizes = [8, 256], strides = [1, 1]} : vector<8x384xf32> to vector<8x256xf32>
    %92 = vector.extract_strided_slice %90 {offsets = [0, 0], sizes = [8, 256], strides = [1, 1]} : vector<8x384xf32> to vector<8x256xf32>
    %93 = arith.addf %91, %92 : vector<8x256xf32>
    %94 = arith.negf %93 : vector<8x256xf32>
    %95 = math.exp %94 : vector<8x256xf32>
    %cst_23 = arith.constant 1.000000e+00 : f32
    %96 = vector.broadcast %cst_23 : f32 to vector<8x256xf32>
    %97 = arith.addf %96, %95 : vector<8x256xf32>
    %98 = arith.divf %96, %97 : vector<8x256xf32>
    %99 = vector.extract_strided_slice %98 {offsets = [0, 0], sizes = [8, 128], strides = [1, 1]} : vector<8x256xf32> to vector<8x128xf32>
    %100 = vector.extract_strided_slice %98 {offsets = [0, 128], sizes = [8, 128], strides = [1, 1]} : vector<8x256xf32> to vector<8x128xf32>
    %101 = vector.extract_strided_slice %89 {offsets = [0, 256], sizes = [8, 128], strides = [1, 1]} : vector<8x384xf32> to vector<8x128xf32>
    %102 = vector.extract_strided_slice %90 {offsets = [0, 256], sizes = [8, 128], strides = [1, 1]} : vector<8x384xf32> to vector<8x128xf32>
    %103 = arith.addf %102, %18 : vector<8x128xf32>
    %104 = arith.mulf %99, %103 : vector<8x128xf32>
    %105 = arith.addf %101, %104 : vector<8x128xf32>
    %106 = math.tanh %105 : vector<8x128xf32>
    %cst_24 = arith.constant 1.000000e+00 : f32
    %107 = vector.broadcast %cst_24 : f32 to vector<8x128xf32>
    %108 = arith.subf %107, %100 : vector<8x128xf32>
    %109 = arith.mulf %108, %106 : vector<8x128xf32>
    %110 = arith.mulf %100, %88 : vector<8x128xf32>
    %111 = arith.addf %109, %110 : vector<8x128xf32>
    %112 = vector.extract_strided_slice %16 {offsets = [32, 0], sizes = [8, 384], strides = [1, 1]} : vector<48x384xf32> to vector<8x384xf32>
    %cst_25 = arith.constant dense<0.000000e+00> : vector<8x384xf32>
    %113 = tpu.matmul %111, %4, %cst_25 {dimension_numbers = #tpu.dot_dimension_numbers<[1], [0], [0], [1], [0, 0, 1, 1], [], []>} : vector<8x128xf32>, vector<128x384xf32>, vector<8x384xf32> -> vector<8x384xf32>
    %114 = vector.extract_strided_slice %112 {offsets = [0, 0], sizes = [8, 256], strides = [1, 1]} : vector<8x384xf32> to vector<8x256xf32>
    %115 = vector.extract_strided_slice %113 {offsets = [0, 0], sizes = [8, 256], strides = [1, 1]} : vector<8x384xf32> to vector<8x256xf32>
    %116 = arith.addf %114, %115 : vector<8x256xf32>
    %117 = arith.negf %116 : vector<8x256xf32>
    %118 = math.exp %117 : vector<8x256xf32>
    %cst_26 = arith.constant 1.000000e+00 : f32
    %119 = vector.broadcast %cst_26 : f32 to vector<8x256xf32>
    %120 = arith.addf %119, %118 : vector<8x256xf32>
    %121 = arith.divf %119, %120 : vector<8x256xf32>
    %122 = vector.extract_strided_slice %121 {offsets = [0, 0], sizes = [8, 128], strides = [1, 1]} : vector<8x256xf32> to vector<8x128xf32>
    %123 = vector.extract_strided_slice %121 {offsets = [0, 128], sizes = [8, 128], strides = [1, 1]} : vector<8x256xf32> to vector<8x128xf32>
    %124 = vector.extract_strided_slice %112 {offsets = [0, 256], sizes = [8, 128], strides = [1, 1]} : vector<8x384xf32> to vector<8x128xf32>
    %125 = vector.extract_strided_slice %113 {offsets = [0, 256], sizes = [8, 128], strides = [1, 1]} : vector<8x384xf32> to vector<8x128xf32>
    %126 = arith.addf %125, %18 : vector<8x128xf32>
    %127 = arith.mulf %122, %126 : vector<8x128xf32>
    %128 = arith.addf %124, %127 : vector<8x128xf32>
    %129 = math.tanh %128 : vector<8x128xf32>
    %cst_27 = arith.constant 1.000000e+00 : f32
    %130 = vector.broadcast %cst_27 : f32 to vector<8x128xf32>
    %131 = arith.subf %130, %123 : vector<8x128xf32>
    %132 = arith.mulf %131, %129 : vector<8x128xf32>
    %133 = arith.mulf %123, %111 : vector<8x128xf32>
    %134 = arith.addf %132, %133 : vector<8x128xf32>
    %135 = vector.extract_strided_slice %16 {offsets = [40, 0], sizes = [8, 384], strides = [1, 1]} : vector<48x384xf32> to vector<8x384xf32>
    %cst_28 = arith.constant dense<0.000000e+00> : vector<8x384xf32>
    %136 = tpu.matmul %134, %4, %cst_28 {dimension_numbers = #tpu.dot_dimension_numbers<[1], [0], [0], [1], [0, 0, 1, 1], [], []>} : vector<8x128xf32>, vector<128x384xf32>, vector<8x384xf32> -> vector<8x384xf32>
    %137 = vector.extract_strided_slice %135 {offsets = [0, 0], sizes = [8, 256], strides = [1, 1]} : vector<8x384xf32> to vector<8x256xf32>
    %138 = vector.extract_strided_slice %136 {offsets = [0, 0], sizes = [8, 256], strides = [1, 1]} : vector<8x384xf32> to vector<8x256xf32>
    %139 = arith.addf %137, %138 : vector<8x256xf32>
    %140 = arith.negf %139 : vector<8x256xf32>
    %141 = math.exp %140 : vector<8x256xf32>
    %cst_29 = arith.constant 1.000000e+00 : f32
    %142 = vector.broadcast %cst_29 : f32 to vector<8x256xf32>
    %143 = arith.addf %142, %141 : vector<8x256xf32>
    %144 = arith.divf %142, %143 : vector<8x256xf32>
    %145 = vector.extract_strided_slice %144 {offsets = [0, 0], sizes = [8, 128], strides = [1, 1]} : vector<8x256xf32> to vector<8x128xf32>
    %146 = vector.extract_strided_slice %144 {offsets = [0, 128], sizes = [8, 128], strides = [1, 1]} : vector<8x256xf32> to vector<8x128xf32>
    %147 = vector.extract_strided_slice %135 {offsets = [0, 256], sizes = [8, 128], strides = [1, 1]} : vector<8x384xf32> to vector<8x128xf32>
    %148 = vector.extract_strided_slice %136 {offsets = [0, 256], sizes = [8, 128], strides = [1, 1]} : vector<8x384xf32> to vector<8x128xf32>
    %149 = arith.addf %148, %18 : vector<8x128xf32>
    %150 = arith.mulf %145, %149 : vector<8x128xf32>
    %151 = arith.addf %147, %150 : vector<8x128xf32>
    %152 = math.tanh %151 : vector<8x128xf32>
    %cst_30 = arith.constant 1.000000e+00 : f32
    %153 = vector.broadcast %cst_30 : f32 to vector<8x128xf32>
    %154 = arith.subf %153, %146 : vector<8x128xf32>
    %155 = arith.mulf %154, %152 : vector<8x128xf32>
    %156 = arith.mulf %146, %134 : vector<8x128xf32>
    %157 = arith.addf %155, %156 : vector<8x128xf32>
    %cst_31 = arith.constant dense<0.000000e+00> : vector<8x4xf32>
    %158 = tpu.matmul %157, %6, %cst_31 {dimension_numbers = #tpu.dot_dimension_numbers<[1], [0], [0], [1], [0, 0, 1, 1], [], []>} : vector<8x128xf32>, vector<128x4xf32>, vector<8x4xf32> -> vector<8x4xf32>
    %159 = vector.broadcast %7 : vector<1x4xf32> to vector<8x4xf32>
    %160 = arith.addf %158, %159 : vector<8x4xf32>
    %c0_32 = arith.constant 0 : index
    %c0_33 = arith.constant 0 : index
    %161 = vector.load %arg2[%c0_32, %c0_33] : memref<8x4xf32, #tpu.memory_space<vmem>>, vector<8x4xf32>
    tpu.vector_store %arg2[%c0_32, %c0_33], %160 {strides = array<i32>} : memref<8x4xf32, #tpu.memory_space<vmem>>, vector<8x4xf32>,
    return
  }
}

</mosaic_0001>

<bundles_post_ra>
// kernel: tpu_custom_call.1
= control target key start
LH: loop header
LB: loop body
LE: loop exit
PB: predicated region body
PF: predicated region fallthrough
CT: control target
= control target key end

     0   :  { %7 = vsyncpa [#allocation3], 0  ;;  %s1144_s12 = smov [#allocation2]   ;;  %s1145_s14 = smov 384   ;;  %s1705_s0 = inlined_call_operand.vmem [shape: f32[48,16], index: 0, kind: input, shape index: {}]   ;;  %s1706_s1 = inlined_call_operand.hbm [shape: f32[368,384], index: 1, kind: input, shape index: {}]   ;;  %s1707_s2 = inlined_call_operand.vmem [shape: f32[8,4], index: 2, kind: output, shape index: {}]  }
   0x1   :  { %s14_s11 = sshll.u32 %s1706_s1, 4  ;;  %s16_s13 = sshll.u32 %s1144_s12, 4  ;;  %s15_s11 = int_to_ptr.hbm [resolvable:$true] %s14_s11  ;;  %s17_s13 = int_to_ptr.vmem [resolvable:$true] %s16_s13 }
   0x2   :  { %s1146_s15 = smov 24  }
   0x3   :  { %22 = dma.hbm_to_vmem [thread:$0]  %s15_s11, 17664, %s17_s13, [#allocation3], %s1145_s14, %s1145_s14, %s1146_s15  }
   0x4   :  { %1142 = dma.done.wait [#allocation3], 17664  }
   0x5   :  { %1143 = vsyncadd [#allocation3], 4294949632  ;;  %v28_v0 = vld [vmem:[#allocation2 + $0x18] sm:$0xff]  ;;  %v27_v1 = vld [vmem:[#allocation2] sm:$0xff]  ;;  %vm128_vm0 = vcmask 130048   ;;  %v1147_v43 = vmov 0.0  }
   0x6   :  { %161 = vmatpush.msra.mxu0 %v28_v0  ;;  %v122_v2 = vld [vmem:[%s1705_s0] sm:$0xff]  ;;  %v123_v3 = vld [vmem:[%s1705_s0 + $0x8] sm:$0xff]  ;;  %v1176_v5 = vld [vmem:[#allocation2 + $0x270] sm:$0xff]  ;;  %vm195_vm1 = vcmask 523264  }
   0x7   :  { %v1174_v4 = vld [vmem:[#allocation2 + $0x288] sm:$0xff]  ;;  %v1179_v6 = vld [vmem:[#allocation2 + $0x258] sm:$0xff]  ;;  %v51_v7 = vld [vmem:[#allocation2 + $0xf0] sm:$0xff] }
   0x8   :  { %162 = vmatpush.msra.mxu0 %v27_v1  ;;  %v52_v8 = vld [vmem:[#allocation2 + $0xf8] sm:$0xff]  ;;  %222 = vmatpush.msra.mxu1 %v51_v7  ;;  %v49_v10 = vld [vmem:[#allocation2 + $0xe0] sm:$0xff]  ;;  %v124_v13 = vld [vmem:[%s1705_s0 + $0x10] sm:$0xff] }
   0x9   :  { %994 = vmatmul.msk.f32.vlgmr.msra.gmra.mxu0 %vm128_vm0, %v122_v2  ;;  %v48_v9 = vld [vmem:[#allocation2 + $0xd8] sm:$0xff]  ;;  %v1182_v11 = vld [vmem:[#allocation2 + $0x240] sm:$0xff]  ;;  %257 = vmatpush.msra.mxu2 %v52_v8  ;;  %v46_v14 = vld [vmem:[#allocation2 + $0xc8] sm:$0xff] }
   0xa   :  { %319 = vmatpush.msrb.mxu0 %v1174_v4  ;;  %v45_v12 = vld [vmem:[#allocation2 + $0xc0] sm:$0xff]  ;;  %1030 = vmatpush.msra.mxu3 %v51_v7  ;;  %v1188_v15 = vld [vmem:[#allocation2 + $0x228] sm:$0xff]  ;;  %v43_v17 = vld [vmem:[#allocation2 + $0xb0] sm:$0xff] }
   0xb   :  { %223 = vmatpush.msra.mxu1 %v48_v9  ;;  %258 = vmatpush.msra.mxu2 %v49_v10  ;;  %v42_v16 = vld [vmem:[#allocation2 + $0xa8] sm:$0xff]  ;;  %v1192_v18 = vld [vmem:[#allocation2 + $0x210] sm:$0xff]  ;;  %v40_v20 = vld [vmem:[#allocation2 + $0x98] sm:$0xff] }
   0xc   :  { %320 = vmatpush.msrb.mxu0 %v1176_v5  ;;  %1031 = vmatpush.msra.mxu3 %v48_v9  ;;  %v39_v19 = vld [vmem:[#allocation2 + $0x90] sm:$0xff]  ;;  %v1195_v21 = vld [vmem:[#allocation2 + $0x1f8] sm:$0xff]  ;;  %v1198_v22 = vld [vmem:[#allocation2 + $0x1e0] sm:$0xff] }
   0xd   :  { %224 = vmatpush.msra.mxu1 %v45_v12  ;;  %259 = vmatpush.msra.mxu2 %v46_v14  ;;  %v125_v23 = vld [vmem:[%s1705_s0 + $0x18] sm:$0xff]  ;;  %v1204_v24 = vld [vmem:[#allocation2 + $0x1c8] sm:$0xff]  ;;  %v1208_v25 = vld [vmem:[#allocation2 + $0x1b0] sm:$0xff] }
   0xe   :  { %321 = vmatpush.msrb.mxu0 %v1179_v6  ;;  %1032 = vmatpush.msra.mxu3 %v45_v12  ;;  %v1211_v26 = vld [vmem:[#allocation2 + $0x198] sm:$0xff]  ;;  %v1214_v27 = vld [vmem:[#allocation2 + $0x180] sm:$0xff]  ;;  %v127_v29 = vld [vmem:[%s1705_s0 + $0x28] sm:$0xff] }
   0xf   :  { %225 = vmatpush.msra.mxu1 %v42_v16  ;;  %260 = vmatpush.msra.mxu2 %v43_v17  ;;  %v126_v28 = vld [vmem:[%s1705_s0 + $0x20] sm:$0xff]  ;;  %v36_v30 = vld [vmem:[#allocation2 + $0x78] sm:$0xff]  ;;  %v1226_v32 = vld [vmem:[#allocation2 + $0x168] sm:$0xff] }
  0x10   :  { %322 = vmatpush.msrb.mxu0 %v1182_v11  ;;  %1033 = vmatpush.msra.mxu3 %v42_v16  ;;  %v37_v31 = vld [vmem:[#allocation2 + $0x80] sm:$0xff]  ;;  %v34_v34 = vld [vmem:[#allocation2 + $0x68] sm:$0xff]  ;;  %v1229_v35 = vld [vmem:[#allocation2 + $0x150] sm:$0xff] }
  0x11   :  { %995 = vmatmul.msk.f32.gmra.mxu0 %vm128_vm0, %v123_v3  ;;  %226 = vmatpush.msra.mxu1 %v39_v19  ;;  %v33_v33 = vld [vmem:[#allocation2 + $0x60] sm:$0xff]  ;;  %v30_v36 = vld [vmem:[#allocation2 + $0x48] sm:$0xff]  ;;  %v31_v37 = vld [vmem:[#allocation2 + $0x50] sm:$0xff] }
  0x12   :  { %323 = vmatpush.msrb.mxu0 %v1188_v15  ;;  %261 = vmatpush.msra.mxu2 %v40_v20  ;;  %v1232_v38 = vld [vmem:[#allocation2 + $0x138] sm:$0xff]  ;;  %v1237_v40 = vld [vmem:[#allocation2 + $0x120] sm:$0xff]  ;;  %v1239_v41 = vld [vmem:[#allocation2 + $0x290] sm:$0xff] }
  0x13   :  { %1034 = vmatpush.msra.mxu3 %v39_v19  ;;  %227 = vmatpush.msra.mxu1 %v36_v30  ;;  %1723 = vst [vmem:[#allocation5_spill] sm:$0xff] %v1232_v38  ;;  %v1235_v39 = vld [vmem:[#allocation2 + $0x298] sm:$0xff]  ;;  %v1248_v44 = vld [vmem:[#allocation2 + $0x260] sm:$0xff]  ;;  %v1254_v46 = vld [vmem:[#allocation2 + $0x268] sm:$0xff] }
  0x14   :  { %324 = vmatpush.msrb.mxu0 %v1192_v18  ;;  %262 = vmatpush.msra.mxu2 %v37_v31  ;;  %1724 = vst [vmem:[#allocation6_spill] sm:$0xff] %v1237_v40  ;;  %v1244_v42 = vld [vmem:[#allocation2 + $0x278] sm:$0xff]  ;;  %v1252_v45 = vld [vmem:[#allocation2 + $0x280] sm:$0xff]  ;;  %v1256_v47 = vld [vmem:[#allocation2 + $0x248] sm:$0xff] }
  0x15   :  { %1035 = vmatpush.msra.mxu3 %v36_v30  ;;  %228 = vmatpush.msra.mxu1 %v33_v33  ;;  %v1261_v48 = vld [vmem:[#allocation2 + $0x230] sm:$0xff]  ;;  %v1268_v50 = vld [vmem:[#allocation2 + $0x218] sm:$0xff]  ;;  %v1273_v51 = vld [vmem:[#allocation2 + $0x200] sm:$0xff] }
  0x16   :  { %325 = vmatpush.msrb.mxu0 %v1195_v21  ;;  %263 = vmatpush.msra.mxu2 %v34_v34  ;;  %v1263_v49 = vld [vmem:[#allocation2 + $0x250] sm:$0xff]  ;;  %v1277_v52 = vld [vmem:[#allocation2 + $0x238] sm:$0xff]  ;;  %v1279_v53 = vld [vmem:[#allocation2 + $0x1e8] sm:$0xff] }
  0x17   :  { %1036 = vmatpush.msra.mxu3 %v33_v33  ;;  %229 = vmatpush.msra.mxu1 %v30_v36  ;;  %v1281_v54 = vld [vmem:[#allocation2 + $0x220] sm:$0xff]  ;;  %v1286_v55 = vld [vmem:[#allocation2 + $0x1d0] sm:$0xff]  ;;  %v1288_v56 = vld [vmem:[#allocation2 + $0x208] sm:$0xff] }
  0x18   :  { %326 = vmatpush.msrb.mxu0 %v1198_v22  ;;  %264 = vmatpush.msra.mxu2 %v31_v37  ;;  %v1293_v57 = vld [vmem:[#allocation2 + $0x1b8] sm:$0xff]  ;;  %v1298_v58 = vld [vmem:[#allocation2 + $0x1a0] sm:$0xff]  ;;  %v1302_v59 = vld [vmem:[#allocation2 + $0x1f0] sm:$0xff] }
  0x19   :  { %996 = vmatmul.msk.f32.gmra.mxu0 %vm128_vm0, %v124_v13  ;;  %1037 = vmatpush.msra.mxu3 %v30_v36  ;;  %v1304_v60 = vld [vmem:[#allocation2 + $0x188] sm:$0xff]  ;;  %v1309_v61 = vld [vmem:[#allocation2 + $0x1d8] sm:$0xff]  ;;  %v1311_v62 = vld [vmem:[#allocation2 + $0x170] sm:$0xff] }
  0x1a   :  { %327 = vmatpush.msrb.mxu0 %v1204_v24  ;;  %359 = vmatpush.msrb.mxu2 %v1235_v39  ;;  %v1314_v63 = vld [vmem:[#allocation2 + $0x30] ss:$0 sm:$0xff]  ;;  %v1318_v0 = vld [vmem:[#allocation2 + $0x158] sm:$0xff]  ;;  %v1323_v3 = vld [vmem:[#allocation2 + $0x140] sm:$0xff] }
  0x1b   :  { %339 = vmatpush.msrb.mxu1 %v1239_v41  ;;  %1725 = vst [vmem:[#allocation7_spill] sm:$0xff] %v1318_v0  ;;  %v1329_v8 = vld [vmem:[#allocation2 + $0x1c0] sm:$0xff]  ;;  %v1331_v9 = vld [vmem:[#allocation2 + $0x1a8] sm:$0xff]  ;;  %v1343_v13 = vld [vmem:[#allocation2 + $0x190] sm:$0xff] }
  0x1c   :  { %328 = vmatpush.msrb.mxu0 %v1208_v25  ;;  %360 = vmatpush.msrb.mxu2 %v1252_v45  ;;  %1726 = vst [vmem:[#allocation8_spill] sm:$0xff] %v1323_v3  ;;  %v1333_v10 = vld [vmem:[#allocation2 + $0x128] sm:$0xff]  ;;  %v53_v12 = vld [vmem:[#allocation2 + $0x100] sm:$0xff]  ;;  %v47_v19 = vld [vmem:[#allocation2 + $0xd0] sm:$0xff] }
  0x1d   :  { %340 = vmatpush.msrb.mxu1 %v1244_v42  ;;  %1727 = vst [vmem:[#allocation9_spill] sm:$0xff] %v1333_v10  ;;  %292 = vmatpush.msrb.mxu3 %v53_v12  ;;  %v50_v16 = vld [vmem:[#allocation2 + $0xe8] sm:$0xff]  ;;  %v41_v30 = vld [vmem:[#allocation2 + $0xa0] sm:$0xff]  ;;  %v1368_v34 = vld [vmem:[#allocation2 + $0x130] sm:$0xff] }
  0x1e   :  { %329 = vmatpush.msrb.mxu0 %v1211_v26  ;;  %361 = vmatpush.msrb.mxu2 %v1254_v46  ;;  %v1365_v31 = vld [vmem:[#allocation2 + $0x148] sm:$0xff]  ;;  %1729 = vst [vmem:[#allocation11_spill] sm:$0xff] %v1368_v34  ;;  %v32_v12 = vld [vmem:[#allocation2 + $0x58] sm:$0xff] }
  0x1f   :  { %341 = vmatpush.msrb.mxu1 %v1248_v44  ;;  %293 = vmatpush.msrb.mxu3 %v50_v16  ;;  %1728 = vst [vmem:[#allocation10_spill] sm:$0xff] %v1365_v31  ;;  %v38_v33 = vld [vmem:[#allocation2 + $0x88] sm:$0xff] }
  0x20   :  { %330 = vmatpush.msrb.mxu0 %v1214_v27  ;;  %362 = vmatpush.msrb.mxu2 %v1263_v49 }
  0x21   :  { %997 = vmatmul.msk.f32.gmra.mxu0 %vm128_vm0, %v125_v23  ;;  %342 = vmatpush.msrb.mxu1 %v1256_v47  ;;  %v1355_v23 = vld [vmem:[#allocation2 + $0x178] sm:$0xff] }
  0x22   :  { %331 = vmatpush.msrb.mxu0 %v1226_v32  ;;  %363 = vmatpush.msrb.mxu2 %v1277_v52 }
  0x23   :  { %343 = vmatpush.msrb.mxu1 %v1261_v48  ;;  %294 = vmatpush.msrb.mxu3 %v47_v19 }
  0x24   :  { %332 = vmatpush.msrb.mxu0 %v1229_v35  ;;  %364 = vmatpush.msrb.mxu2 %v1281_v54 }
  0x25   :  { %344 = vmatpush.msrb.mxu1 %v1268_v50 }
  0x26   :  { %333 = vmatpush.msrb.mxu0 %v1232_v38  ;;  %365 = vmatpush.msrb.mxu2 %v1288_v56 }
  0x27   :  { %345 = vmatpush.msrb.mxu1 %v1273_v51 }
  0x28   :  { %334 = vmatpush.msrb.mxu0 %v1237_v40  ;;  %366 = vmatpush.msrb.mxu2 %v1302_v59 }
  0x29   :  { %998 = vmatmul.msk.f32.gmra.mxu0 %vm128_vm0, %v126_v28  ;;  %346 = vmatpush.msrb.mxu1 %v1279_v53  ;;  %v44_v28 = vld [vmem:[#allocation2 + $0xb8] sm:$0xff] }
  0x2a   :  { %447 = vmatpush.msra.mxu0 %v1239_v41  ;;  %367 = vmatpush.msrb.mxu2 %v1309_v61 }
  0x2b   :  { %347 = vmatpush.msrb.mxu1 %v1286_v55  ;;  %295 = vmatpush.msrb.mxu3 %v44_v28 }
  0x2c   :  { %448 = vmatpush.msra.mxu0 %v1244_v42  ;;  %368 = vmatpush.msrb.mxu2 %v1329_v8 }
  0x2d   :  { %348 = vmatpush.msrb.mxu1 %v1293_v57  ;;  %296 = vmatpush.msrb.mxu3 %v41_v30 }
  0x2e   :  { %449 = vmatpush.msra.mxu0 %v1248_v44  ;;  %369 = vmatpush.msrb.mxu2 %v1331_v9 }
  0x2f   :  { %349 = vmatpush.msrb.mxu1 %v1298_v58  ;;  %297 = vmatpush.msrb.mxu3 %v38_v33 }
  0x30   :  { %450 = vmatpush.msra.mxu0 %v1256_v47  ;;  %370 = vmatpush.msrb.mxu2 %v1343_v13 }
  0x31   :  { %999 = vmatmul.msk.f32.gmra.mxu0 %vm128_vm0, %v127_v29  ;;  %350 = vmatpush.msrb.mxu1 %v1304_v60  ;;  %v1357_v29 = vld [vmem:[#allocation2 + $0x160] sm:$0xff] }
  0x32   :  { %451 = vmatpush.msra.mxu0 %v1261_v48  ;;  %371 = vmatpush.msrb.mxu2 %v1355_v23 }
  0x33   :  { %351 = vmatpush.msrb.mxu1 %v1311_v62 }
  0x34   :  { %452 = vmatpush.msra.mxu0 %v1268_v50  ;;  %372 = vmatpush.msrb.mxu2 %v1357_v29 }
  0x35   :  { %352 = vmatpush.msrb.mxu1 %v1318_v0 }
  0x36   :  { %453 = vmatpush.msra.mxu0 %v1273_v51  ;;  %373 = vmatpush.msrb.mxu2 %v1365_v31 }
  0x37   :  { %353 = vmatpush.msrb.mxu1 %v1323_v3 }
  0x38   :  { %454 = vmatpush.msra.mxu0 %v1279_v53  ;;  %374 = vmatpush.msrb.mxu2 %v1368_v34 }
  0x39   :  { %335 = vmatmul.f32.vlgmr.msrb.gmra.mxu0 %v1147_v43  ;;  %354 = vmatpush.msrb.mxu1 %v1333_v10 }
  0x3a   :  { %455 = vmatpush.msra.mxu0 %v1286_v55 }
  0x3c   :  { %456 = vmatpush.msra.mxu0 %v1293_v57 }
  0x3e   :  { %457 = vmatpush.msra.mxu0 %v1298_v58 }
  0x40   :  { %458 = vmatpush.msra.mxu0 %v1304_v60 }
  0x42   :  { %459 = vmatpush.msra.mxu0 %v1311_v62 }
  0x44   :  { %460 = vmatpush.msra.mxu0 %v1318_v0 }
  0x46   :  { %461 = vmatpush.msra.mxu0 %v1323_v3 }
  0x48   :  { %462 = vmatpush.msra.mxu0 %v1333_v10 }
  0x4a   :  { %575 = vmatpush.msrb.mxu0 %v1235_v39 }
  0x4c   :  { %576 = vmatpush.msrb.mxu0 %v1252_v45 }
  0x4e   :  { %577 = vmatpush.msrb.mxu0 %v1254_v46 }
  0x50   :  { %578 = vmatpush.msrb.mxu0 %v1263_v49 }
  0x52   :  { %579 = vmatpush.msrb.mxu0 %v1277_v52 }
  0x54   :  { %580 = vmatpush.msrb.mxu0 %v1281_v54 }
  0x56   :  { %581 = vmatpush.msrb.mxu0 %v1288_v56 }
  0x58   :  { %582 = vmatpush.msrb.mxu0 %v1302_v59 }
  0x5a   :  { %583 = vmatpush.msrb.mxu0 %v1309_v61 }
  0x5c   :  { %584 = vmatpush.msrb.mxu0 %v1329_v8 }
  0x5e   :  { %585 = vmatpush.msrb.mxu0 %v1331_v9 }
  0x60   :  { %586 = vmatpush.msrb.mxu0 %v1343_v13 }
  0x62   :  { %587 = vmatpush.msrb.mxu0 %v1355_v23 }
  0x64   :  { %588 = vmatpush.msrb.mxu0 %v1357_v29 }
  0x66   :  { %589 = vmatpush.msrb.mxu0 %v1365_v31 }
  0x68   :  { %590 = vmatpush.msrb.mxu0 %v1368_v34 }
  0x86   :  { %v164_v1 = vpop.f32.mrf.mxu0 }
  0x87   :  { %v165_v2 = vadd.f32 %v164_v1, %v1314_v63  ;;  %v35_v1 = vld [vmem:[#allocation2 + $0x70] sm:$0xff] }
  0x88   :  { %298 = vmatpush.msrb.mxu3 %v35_v1 }
  0x89   :  { %v1327_v7 = vmax.f32 %v165_v2, 0.0 }
  0x8a   :  { %299 = vmatpush.msrb.mxu3 %v32_v12 }
  0x8b   :  { %1000 = vmatmul.msk.f32.vlgmr.msra.gmra.mxu1 %vm195_vm1, %v1327_v7  ;;  %1006 = vmatmul.msk.f32.vlgmr.msra.gmra.mxu2 %vm195_vm1, %v1327_v7 }
  0x8c   :  { %467 = vmatpush.msra.mxu1 %v1235_v39  ;;  %535 = vmatpush.msra.mxu2 %v1174_v4 }
  0x8e   :  { %v167_v14 = vpop.f32.mrf.mxu0  ;;  %468 = vmatpush.msra.mxu1 %v1252_v45  ;;  %536 = vmatpush.msra.mxu2 %v1176_v5 }
  0x8f   :  { %v168_v17 = vadd.f32 %v167_v14, %v1314_v63 }
  0x90   :  { %469 = vmatpush.msra.mxu1 %v1254_v46  ;;  %537 = vmatpush.msra.mxu2 %v1179_v6 }
  0x91   :  { %v1353_v20 = vmax.f32 %v168_v17, 0.0 }
  0x92   :  { %470 = vmatpush.msra.mxu1 %v1263_v49  ;;  %538 = vmatpush.msra.mxu2 %v1182_v11 }
  0x93   :  { %1001 = vmatmul.msk.f32.gmra.mxu1 %vm195_vm1, %v1353_v20  ;;  %1007 = vmatmul.msk.f32.gmra.mxu2 %vm195_vm1, %v1353_v20 }
  0x94   :  { %471 = vmatpush.msra.mxu1 %v1277_v52  ;;  %539 = vmatpush.msra.mxu2 %v1188_v15 }
  0x96   :  { %v170_v36 = vpop.f32.mrf.mxu0  ;;  %472 = vmatpush.msra.mxu1 %v1281_v54  ;;  %540 = vmatpush.msra.mxu2 %v1192_v18 }
  0x97   :  { %v171_v37 = vadd.f32 %v170_v36, %v1314_v63 }
  0x98   :  { %473 = vmatpush.msra.mxu1 %v1288_v56  ;;  %541 = vmatpush.msra.mxu2 %v1195_v21 }
  0x99   :  { %v1377_v2 = vmax.f32 %v171_v37, 0.0 }
  0x9a   :  { %474 = vmatpush.msra.mxu1 %v1302_v59  ;;  %542 = vmatpush.msra.mxu2 %v1198_v22 }
  0x9b   :  { %1002 = vmatmul.msk.f32.gmra.mxu1 %vm195_vm1, %v1377_v2  ;;  %1008 = vmatmul.msk.f32.gmra.mxu2 %vm195_vm1, %v1377_v2 }
  0x9c   :  { %475 = vmatpush.msra.mxu1 %v1309_v61  ;;  %543 = vmatpush.msra.mxu2 %v1204_v24 }
  0x9e   :  { %v173_v14 = vpop.f32.mrf.mxu0  ;;  %476 = vmatpush.msra.mxu1 %v1329_v8  ;;  %544 = vmatpush.msra.mxu2 %v1208_v25 }
  0x9f   :  { %v174_v16 = vadd.f32 %v173_v14, %v1314_v63 }
  0xa0   :  { %477 = vmatpush.msra.mxu1 %v1331_v9  ;;  %545 = vmatpush.msra.mxu2 %v1211_v26 }
  0xa1   :  { %v1394_v17 = vmax.f32 %v174_v16, 0.0 }
  0xa2   :  { %478 = vmatpush.msra.mxu1 %v1343_v13  ;;  %546 = vmatpush.msra.mxu2 %v1214_v27 }
  0xa3   :  { %1003 = vmatmul.msk.f32.gmra.mxu1 %vm195_vm1, %v1394_v17  ;;  %1009 = vmatmul.msk.f32.gmra.mxu2 %vm195_vm1, %v1394_v17 }
  0xa4   :  { %479 = vmatpush.msra.mxu1 %v1355_v23  ;;  %547 = vmatpush.msra.mxu2 %v1226_v32 }
  0xa6   :  { %v176_v19 = vpop.f32.mrf.mxu0  ;;  %480 = vmatpush.msra.mxu1 %v1357_v29  ;;  %548 = vmatpush.msra.mxu2 %v1229_v35 }
  0xa7   :  { %v177_v28 = vadd.f32 %v176_v19, %v1314_v63 }
  0xa8   :  { %481 = vmatpush.msra.mxu1 %v1365_v31  ;;  %549 = vmatpush.msra.mxu2 %v1232_v38 }
  0xa9   :  { %v1412_v30 = vmax.f32 %v177_v28, 0.0 }
  0xaa   :  { %482 = vmatpush.msra.mxu1 %v1368_v34  ;;  %550 = vmatpush.msra.mxu2 %v1237_v40 }
  0xab   :  { %1004 = vmatmul.msk.f32.vlgmr.msra.gmra.mxu3 %vm195_vm1, %v1412_v30  ;;  %1010 = vmatmul.msk.f32.gmra.mxu2 %vm195_vm1, %v1412_v30 }
  0xac   :  { %355 = vmatmul.f32.vlgmr.msrb.gmra.mxu1 %v1147_v43  ;;  %427 = vmatpush.msra.mxu3 %v1174_v4 }
  0xad   :  { %643 = vmatpush.msrb.mxu1 %v1174_v4 }
  0xae   :  { %v179_v33 = vpop.f32.mrf.mxu0  ;;  %428 = vmatpush.msra.mxu3 %v1176_v5 }
  0xaf   :  { %v180_v36 = vadd.f32 %v179_v33, %v1314_v63  ;;  %644 = vmatpush.msrb.mxu1 %v1176_v5 }
  0xb0   :  { %429 = vmatpush.msra.mxu3 %v1179_v6 }
  0xb1   :  { %v1432_v37 = vmax.f32 %v180_v36, 0.0  ;;  %645 = vmatpush.msrb.mxu1 %v1179_v6 }
  0xb2   :  { %430 = vmatpush.msra.mxu3 %v1182_v11 }
  0xb3   :  { %1005 = vmatmul.msk.f32.gmra.mxu3 %vm195_vm1, %v1432_v37  ;;  %1011 = vmatmul.msk.f32.gmra.mxu2 %vm195_vm1, %v1432_v37 }
  0xb4   :  { %431 = vmatpush.msra.mxu3 %v1188_v15  ;;  %646 = vmatpush.msrb.mxu1 %v1182_v11 }
  0xb6   :  { %432 = vmatpush.msra.mxu3 %v1192_v18  ;;  %647 = vmatpush.msrb.mxu1 %v1188_v15  ;;  %v336_v1 = vpop.f32.mrf.mxu0 }
  0xb8   :  { %433 = vmatpush.msra.mxu3 %v1195_v21  ;;  %648 = vmatpush.msrb.mxu1 %v1192_v18 }
  0xba   :  { %434 = vmatpush.msra.mxu3 %v1198_v22  ;;  %649 = vmatpush.msrb.mxu1 %v1195_v21 }
  0xbb   :  { %1012 = vmatmul.msk.f32.vlgmr.msrb.gmra.mxu3 %vm195_vm1, %v1327_v7  ;;  %375 = vmatmul.f32.vlgmr.msrb.gmra.mxu2 %v1147_v43  ;;  %v55_v43 = vld [vmem:[#allocation2 + $0x108] ss:$8 sm:$0x7] }
  0xbc   :  { %435 = vmatpush.msra.mxu3 %v1204_v24  ;;  %663 = vmatpush.msrb.mxu2 %v1239_v41  ;;  %v189_v63 = vperm.slane %v55_v43, 0  ;;  %v190_v19 = vperm.slane %v55_v43, 1 }
  0xbd   :  { %650 = vmatpush.msrb.mxu1 %v1198_v22 }
  0xbe   :  { %436 = vmatpush.msra.mxu3 %v1208_v25  ;;  %664 = vmatpush.msrb.mxu2 %v1244_v42 }
  0xbf   :  { %651 = vmatpush.msrb.mxu1 %v1204_v24 }
  0xc0   :  { %437 = vmatpush.msra.mxu3 %v1211_v26  ;;  %665 = vmatpush.msrb.mxu2 %v1248_v44 }
  0xc1   :  { %652 = vmatpush.msrb.mxu1 %v1208_v25 }
  0xc2   :  { %438 = vmatpush.msra.mxu3 %v1214_v27  ;;  %666 = vmatpush.msrb.mxu2 %v1256_v47 }
  0xc3   :  { %1013 = vmatmul.msk.f32.gmra.mxu3 %vm195_vm1, %v1353_v20  ;;  %653 = vmatpush.msrb.mxu1 %v1211_v26 }
  0xc4   :  { %439 = vmatpush.msra.mxu3 %v1226_v32  ;;  %667 = vmatpush.msrb.mxu2 %v1261_v48 }
  0xc5   :  { %654 = vmatpush.msrb.mxu1 %v1214_v27 }
  0xc6   :  { %440 = vmatpush.msra.mxu3 %v1229_v35  ;;  %668 = vmatpush.msrb.mxu2 %v1268_v50 }
  0xc7   :  { %655 = vmatpush.msrb.mxu1 %v1226_v32 }
  0xc8   :  { %441 = vmatpush.msra.mxu3 %v1232_v38  ;;  %669 = vmatpush.msrb.mxu2 %v1273_v51 }
  0xc9   :  { %656 = vmatpush.msrb.mxu1 %v1229_v35 }
  0xca   :  { %442 = vmatpush.msra.mxu3 %v1237_v40  ;;  %670 = vmatpush.msrb.mxu2 %v1279_v53 }
  0xcb   :  { %1014 = vmatmul.msk.f32.gmra.mxu3 %vm195_vm1, %v1377_v2  ;;  %657 = vmatpush.msrb.mxu1 %v1232_v38 }
  0xcc   :  { %555 = vmatpush.msrb.mxu3 %v1239_v41  ;;  %671 = vmatpush.msrb.mxu2 %v1286_v55 }
  0xcd   :  { %658 = vmatpush.msrb.mxu1 %v1237_v40 }
  0xce   :  { %556 = vmatpush.msrb.mxu3 %v1244_v42  ;;  %672 = vmatpush.msrb.mxu2 %v1293_v57 }
  0xd0   :  { %557 = vmatpush.msrb.mxu3 %v1248_v44  ;;  %673 = vmatpush.msrb.mxu2 %v1298_v58 }
  0xd2   :  { %558 = vmatpush.msrb.mxu3 %v1256_v47  ;;  %674 = vmatpush.msrb.mxu2 %v1304_v60 }
  0xd3   :  { %1015 = vmatmul.msk.f32.gmra.mxu3 %vm195_vm1, %v1394_v17 }
  0xd4   :  { %559 = vmatpush.msrb.mxu3 %v1261_v48  ;;  %675 = vmatpush.msrb.mxu2 %v1311_v62 }
  0xd6   :  { %560 = vmatpush.msrb.mxu3 %v1268_v50  ;;  %676 = vmatpush.msrb.mxu2 %v1318_v0 }
  0xd8   :  { %561 = vmatpush.msrb.mxu3 %v1273_v51  ;;  %677 = vmatpush.msrb.mxu2 %v1323_v3 }
  0xda   :  { %562 = vmatpush.msrb.mxu3 %v1279_v53  ;;  %678 = vmatpush.msrb.mxu2 %v1333_v10 }
  0xdb   :  { %1016 = vmatmul.msk.f32.gmra.mxu3 %vm195_vm1, %v1412_v30 }
  0xdc   :  { %563 = vmatpush.msrb.mxu3 %v1286_v55 }
  0xde   :  { %564 = vmatpush.msrb.mxu3 %v1293_v57 }
  0xe0   :  { %565 = vmatpush.msrb.mxu3 %v1298_v58 }
  0xe2   :  { %566 = vmatpush.msrb.mxu3 %v1304_v60 }
  0xe3   :  { %1017 = vmatmul.msk.f32.gmra.mxu3 %vm195_vm1, %v1432_v37 }
  0xe4   :  { %567 = vmatpush.msrb.mxu3 %v1311_v62 }
  0xe6   :  { %568 = vmatpush.msrb.mxu3 %v1318_v0 }
  0xe8   :  { %569 = vmatpush.msrb.mxu3 %v1323_v3 }
  0xea   :  { %570 = vmatpush.msrb.mxu3 %v1333_v10 }
 0x108   :  { %v231_v7 = vpop.f32.mrf.mxu1 }
 0x109   :  { %v232_v20 = vadd.f32 %v231_v7, %v189_v63 }
 0x10b   :  { %v379_v12 = vadd.f32 %v336_v1, %v232_v20 }
 0x10d   :  { %v1018_v17 = vmul.f32 -1.442695, %v379_v12 }
 0x10e   :  { %v266_v2 = vpop.f32.mrf.mxu2 }
 0x10f   :  { %1042 = vpow2.f32 %v1018_v17  ;;  %v267_v12 = vadd.f32 %v266_v2, %v190_v19 }
 0x110   :  { %v234_v14 = vpop.f32.mrf.mxu1 }
 0x111   :  { %v1521_v16 = vadd.f32 %v234_v14, %v189_v63 }
 0x113   :  { %1730 = vst [vmem:[#allocation12_spill] sm:$0xff] %v1521_v16 }
 0x115   :  { %v1043_v37 = vpop.eup %1042 }
 0x116   :  { %v269_v28 = vpop.f32.mrf.mxu2  ;;  %v387_v7 = vadd.f32 1.0, %v1043_v37 }
 0x117   :  { %v1523_v30 = vadd.f32 %v269_v28, %v190_v19 }
 0x118   :  { %v237_v33 = vpop.f32.mrf.mxu1  ;;  %1044 = vrcp.f32 %v387_v7  ;;  %vm394_vm3 = vweird.f32 %v387_v7 }
 0x119   :  { %1731 = vst [vmem:[#allocation13_spill] sm:$0xff] %v1523_v30  ;;  %v1525_v36 = vadd.f32 %v237_v33, %v189_v63 }
 0x11b   :  { %1732 = vst [vmem:[#allocation14_spill] sm:$0xff] %v1525_v36 }
 0x11e   :  { %v272_v10 = vpop.f32.mrf.mxu2  ;;  %v1045_v17 = vpop.eup %1044 }
 0x11f   :  { %v1527_v40 = vadd.f32 %v272_v10, %v190_v19  ;;  %v390_v30 = vmul.f32 %v1045_v17, %v387_v7  ;;  %vm395_vm2 = vweird.f32 %v1045_v17 }
 0x120   :  { %v240_v34 = vpop.f32.mrf.mxu1  ;;  %vm396_vm4 = vmor %vm394_vm3, %vm395_vm2 }
 0x121   :  { %1733 = vst [vmem:[#allocation15_spill] sm:$0xff] %v1527_v40  ;;  %v1529_v3 = vadd.f32 %v240_v34, %v189_v63  ;;  %v391_v37 = vsub.f32 1.0, %v390_v30  ;;  %v1543_v30 = vperm.slane %v55_v43, 2 }
 0x123   :  { %1734 = vst [vmem:[#allocation16_spill] sm:$0xff] %v1529_v3  ;;  %v392_v40 = vmul.f32 %v1045_v17, %v391_v37 }
 0x124   :  { %1740 = vst [vmem:[#allocation22_spill] sm:$0xff] %v1543_v30 }
 0x126   :  { %v275_v20 = vpop.f32.mrf.mxu2 }
 0x127   :  { %v1531_v1 = vadd.f32 %v275_v20, %v190_v19 }
 0x129   :  { %1735 = vst [vmem:[#allocation17_spill] sm:$0xff] %v1531_v1  ;;  %v356_v14 = vpop.f32.mrf.mxu1 }
 0x12a   :  { %v380_v28 = vadd.f32 %v356_v14, %v267_v12  ;;  %v393_v12 = vadd.f32 %v1045_v17, %v392_v40  ;;  %v398_v14 = vand.u32 2147483647, %v387_v7 }
 0x12c   :  { %v1019_v16 = vmul.f32 -1.442695, %v380_v28  ;;  %v1541_v28 = vld [vmem:[#allocation2 + $0x2a0] ss:$0 sm:$0xff]  ;;  %vm399_vm5 = vcmp.eq.f32.partialorder %v398_v14, 8.507059e+37 }
 0x12e   :  { %1046 = vpow2.f32 %v1019_v16  ;;  %v243_v33 = vpop.f32.mrf.mxu3  ;;  %v278_v36 = vpop.f32.mrf.mxu2  ;;  %v400_v16 = vand.u32 2147483648, %v387_v7 }
 0x12f   :  { %v1533_v38 = vadd.f32 %v243_v33, %v189_v63  ;;  %v1535_v10 = vadd.f32 %v278_v36, %v190_v19  ;;  %v397_v33 = vsel %vm396_vm4, %v1045_v17, %v393_v12 }
 0x131   :  { %1736 = vst [vmem:[#allocation18_spill] sm:$0xff] %v1533_v38  ;;  %v401_v38 = vor.u32 1.1754944e-38, %v400_v16 }
 0x132   :  { %1737 = vst [vmem:[#allocation19_spill] sm:$0xff] %v1535_v10 }
 0x133   :  { %v402_v40 = vsel %vm399_vm5, %v401_v38, %v397_v33 }
 0x134   :  { %v1047_v34 = vpop.eup %1046 }
 0x135   :  { %v388_v3 = vadd.f32 1.0, %v1047_v34 }
 0x136   :  { %v246_v31 = vpop.f32.mrf.mxu3  ;;  %v281_v20 = vpop.f32.mrf.mxu2 }
 0x137   :  { %1048 = vrcp.f32 %v388_v3  ;;  %v1537_v2 = vadd.f32 %v246_v31, %v189_v63  ;;  %v1539_v1 = vadd.f32 %v281_v20, %v190_v19  ;;  %v415_v7 = vand.u32 2147483648, %v388_v3 }
 0x138   :  { %vm409_vm7 = vweird.f32 %v388_v3 }
 0x139   :  { %1738 = vst [vmem:[#allocation20_spill] sm:$0xff] %v1537_v2  ;;  %v416_v17 = vor.u32 1.1754944e-38, %v415_v7 }
 0x13a   :  { %1739 = vst [vmem:[#allocation21_spill] sm:$0xff] %v1539_v1  ;;  %v413_v1 = vand.u32 2147483647, %v388_v3 }
 0x13c   :  { %vm414_vm9 = vcmp.eq.f32.partialorder %v413_v1, 8.507059e+37 }
 0x13d   :  { %v1049_v36 = vpop.eup %1048 }
 0x13e   :  { %v405_v37 = vmul.f32 %v1049_v36, %v388_v3  ;;  %v301_v34 = vpop.f32.mrf.mxu3  ;;  %v376_v10 = vpop.f32.mrf.mxu2  ;;  %vm410_vm6 = vweird.f32 %v1049_v36 }
 0x13f   :  { %v419_v31 = vadd.f32 %v376_v10, %v1541_v28  ;;  %v302_v19 = vadd.f32 %v301_v34, %v1543_v30  ;;  %vm411_vm8 = vmor %vm409_vm7, %vm410_vm6 }
 0x140   :  { %v406_v63 = vsub.f32 1.0, %v405_v37 }
 0x141   :  { %v420_v20 = vmul.f32 %v419_v31, %v402_v40  ;;  %v1751_v40 = vld [vmem:[#allocation13_spill] sm:$0xff] }
 0x142   :  { %v407_v2 = vmul.f32 %v1049_v36, %v406_v63 }
 0x143   :  { %v421_v0 = vadd.f32 %v420_v20, %v302_v19 }
 0x144   :  { %v408_v43 = vadd.f32 %v1049_v36, %v407_v2 }
 0x145   :  { %1050 = vtanh.f32 %v421_v0 }
 0x146   :  { %v304_v12 = vpop.f32.mrf.mxu3  ;;  %v412_v16 = vsel %vm411_vm8, %v1049_v36, %v408_v43  ;;  %v1752_v43 = vld [vmem:[#allocation12_spill] sm:$0xff] }
 0x147   :  { %v1548_v10 = vadd.f32 %v304_v12, %v1543_v30  ;;  %v417_v38 = vsel %vm414_vm9, %v416_v17, %v412_v16 }
 0x148   :  { %v423_v14 = vsub.f32 1.0, %v417_v38  ;;  %v425_v34 = vmul.f32 0.0, %v417_v38 }
 0x14b   :  { %v1051_v33 = vpop.eup %1050 }
 0x14c   :  { %v424_v37 = vmul.f32 %v1051_v33, %v423_v14 }
 0x14e   :  { %v307_v31 = vpop.f32.mrf.mxu3  ;;  %v1550_v63 = vadd.f32 %v425_v34, %v424_v37 }
 0x14f   :  { %v1553_v3 = vadd.f32 %v307_v31, %v1543_v30 }
 0x150   :  { %443 = vmatmul.f32.vlgmr.msra.gmra.mxu3 %v1550_v63  ;;  %463 = vmatmul.f32.vlgmr.msra.gmra.mxu0 %v1550_v63 }
 0x151   :  { %483 = vmatmul.f32.vlgmr.msra.gmra.mxu1 %v1550_v63  ;;  %683 = vmatpush.msra.mxu3 %v1235_v39 }
 0x152   :  { %751 = vmatpush.msra.mxu0 %v1174_v4  ;;  %771 = vmatpush.msra.mxu1 %v1239_v41 }
 0x153   :  { %684 = vmatpush.msra.mxu3 %v1252_v45 }
 0x154   :  { %752 = vmatpush.msra.mxu0 %v1176_v5  ;;  %772 = vmatpush.msra.mxu1 %v1244_v42 }
 0x155   :  { %685 = vmatpush.msra.mxu3 %v1254_v46 }
 0x156   :  { %v310_v0 = vpop.f32.mrf.mxu3  ;;  %753 = vmatpush.msra.mxu0 %v1179_v6  ;;  %773 = vmatpush.msra.mxu1 %v1248_v44  ;;  %v1743_v6 = vld [vmem:[#allocation7_spill] sm:$0xff] }
 0x157   :  { %v1568_v1 = vadd.f32 %v310_v0, %v1543_v30  ;;  %686 = vmatpush.msra.mxu3 %v1263_v49 }
 0x158   :  { %754 = vmatpush.msra.mxu0 %v1182_v11  ;;  %774 = vmatpush.msra.mxu1 %v1256_v47  ;;  %v1744_v11 = vld [vmem:[#allocation10_spill] sm:$0xff] }
 0x159   :  { %1741 = vst [vmem:[#allocation23_spill] sm:$0xff] %v1568_v1  ;;  %687 = vmatpush.msra.mxu3 %v1277_v52 }
 0x15a   :  { %755 = vmatpush.msra.mxu0 %v1188_v15  ;;  %775 = vmatpush.msra.mxu1 %v1261_v48  ;;  %v1745_v15 = vld [vmem:[#allocation5_spill] sm:$0xff] }
 0x15b   :  { %688 = vmatpush.msra.mxu3 %v1281_v54 }
 0x15c   :  { %756 = vmatpush.msra.mxu0 %v1192_v18  ;;  %776 = vmatpush.msra.mxu1 %v1268_v50  ;;  %v1746_v18 = vld [vmem:[#allocation8_spill] sm:$0xff] }
 0x15d   :  { %689 = vmatpush.msra.mxu3 %v1288_v56 }
 0x15e   :  { %v313_v4 = vpop.f32.mrf.mxu3  ;;  %757 = vmatpush.msra.mxu0 %v1195_v21  ;;  %777 = vmatpush.msra.mxu1 %v1273_v51  ;;  %v1747_v21 = vld [vmem:[#allocation11_spill] sm:$0xff] }
 0x15f   :  { %v1583_v5 = vadd.f32 %v313_v4, %v1543_v30  ;;  %690 = vmatpush.msra.mxu3 %v1302_v59 }
 0x160   :  { %758 = vmatpush.msra.mxu0 %v1198_v22  ;;  %778 = vmatpush.msra.mxu1 %v1279_v53  ;;  %v1748_v22 = vld [vmem:[#allocation6_spill] sm:$0xff] }
 0x161   :  { %1742 = vst [vmem:[#allocation24_spill] sm:$0xff] %v1583_v5  ;;  %691 = vmatpush.msra.mxu3 %v1309_v61 }
 0x162   :  { %759 = vmatpush.msra.mxu0 %v1204_v24  ;;  %779 = vmatpush.msra.mxu1 %v1286_v55 }
 0x163   :  { %692 = vmatpush.msra.mxu3 %v1329_v8 }
 0x164   :  { %760 = vmatpush.msra.mxu0 %v1208_v25  ;;  %780 = vmatpush.msra.mxu1 %v1293_v57 }
 0x165   :  { %693 = vmatpush.msra.mxu3 %v1331_v9 }
 0x166   :  { %761 = vmatpush.msra.mxu0 %v1211_v26  ;;  %781 = vmatpush.msra.mxu1 %v1298_v58  ;;  %v1612_v2 = vpop.f32.mrf.mxu3 }
 0x167   :  { %694 = vmatpush.msra.mxu3 %v1343_v13  ;;  %1750 = vst [vmem:[#allocation7_spill] sm:$0xff] %v1612_v2 }
 0x168   :  { %762 = vmatpush.msra.mxu0 %v1214_v27  ;;  %782 = vmatpush.msra.mxu1 %v1304_v60  ;;  %v1749_v27 = vld [vmem:[#allocation9_spill] sm:$0xff] }
 0x169   :  { %695 = vmatpush.msra.mxu3 %v1355_v23 }
 0x16a   :  { %763 = vmatpush.msra.mxu0 %v1226_v32  ;;  %783 = vmatpush.msra.mxu1 %v1311_v62 }
 0x16b   :  { %696 = vmatpush.msra.mxu3 %v1357_v29 }
 0x16c   :  { %764 = vmatpush.msra.mxu0 %v1229_v35  ;;  %784 = vmatpush.msra.mxu1 %v1743_v6 }
 0x16d   :  { %697 = vmatpush.msra.mxu3 %v1744_v11 }
 0x16e   :  { %765 = vmatpush.msra.mxu0 %v1745_v15  ;;  %785 = vmatpush.msra.mxu1 %v1746_v18 }
 0x16f   :  { %698 = vmatpush.msra.mxu3 %v1747_v21 }
 0x170   :  { %766 = vmatpush.msra.mxu0 %v1748_v22  ;;  %786 = vmatpush.msra.mxu1 %v1749_v27 }
 0x1cd   :  { %v464_v36 = vpop.f32.mrf.mxu0 }
 0x1ce   :  { %v488_v19 = vadd.f32 %v464_v36, %v1751_v40 }
 0x1d0   :  { %v1021_v20 = vmul.f32 -1.442695, %v488_v19 }
 0x1d2   :  { %1052 = vpow2.f32 %v1021_v20 }
 0x1d3   :  { %v444_v7 = vpop.f32.mrf.mxu3 }
 0x1d4   :  { %v487_v17 = vadd.f32 %v444_v7, %v1752_v43  ;;  %v484_v7 = vpop.f32.mrf.mxu1 }
 0x1d6   :  { %v1020_v12 = vmul.f32 -1.442695, %v487_v17 }
 0x1d8   :  { %v1053_v16 = vpop.eup %1052  ;;  %1054 = vpow2.f32 %v1020_v12  ;;  %v527_v12 = vadd.f32 %v484_v7, %v1541_v28 }
 0x1d9   :  { %v496_v38 = vadd.f32 1.0, %v1053_v16 }
 0x1db   :  { %1056 = vrcp.f32 %v496_v38  ;;  %v523_v5 = vand.u32 2147483648, %v496_v38  ;;  %vm517_vm15 = vweird.f32 %v496_v38 }
 0x1dd   :  { %v524_v1 = vor.u32 1.1754944e-38, %v523_v5 }
 0x1de   :  { %v1055_v14 = vpop.eup %1054 }
 0x1df   :  { %v495_v33 = vadd.f32 1.0, %v1055_v14 }
 0x1e1   :  { %1058 = vrcp.f32 %v495_v33  ;;  %v1057_v37 = vpop.eup %1056  ;;  %v508_v36 = vand.u32 2147483648, %v495_v33  ;;  %v506_v19 = vand.u32 2147483647, %v495_v33  ;;  %vm502_vm11 = vweird.f32 %v495_v33 }
 0x1e2   :  { %v513_v34 = vmul.f32 %v1057_v37, %v496_v38  ;;  %vm518_vm14 = vweird.f32 %v1057_v37 }
 0x1e3   :  { %v509_v17 = vor.u32 1.1754944e-38, %v508_v36  ;;  %vm507_vm13 = vcmp.eq.f32.partialorder %v506_v19, 8.507059e+37  ;;  %vm519_vm0 = vmor %vm517_vm15, %vm518_vm14 }
 0x1e4   :  { %v514_v4 = vsub.f32 1.0, %v513_v34 }
 0x1e6   :  { %v515_v20 = vmul.f32 %v1057_v37, %v514_v4 }
 0x1e7   :  { %v1059_v31 = vpop.eup %1058 }
 0x1e8   :  { %v498_v0 = vmul.f32 %v1059_v31, %v495_v33  ;;  %vm503_vm10 = vweird.f32 %v1059_v31  ;;  %v516_v30 = vadd.f32 %v1057_v37, %v515_v20 }
 0x1e9   :  { %vm504_vm12 = vmor %vm502_vm11, %vm503_vm10 }
 0x1ea   :  { %v499_v2 = vsub.f32 1.0, %v498_v0  ;;  %v521_v0 = vand.u32 2147483647, %v496_v38  ;;  %v520_v4 = vsel %vm519_vm0, %v1057_v37, %v516_v30  ;;  %v1102_v30 = vld [vmem:[#allocation2 + $0x288] sm:$0xff] }
 0x1ec   :  { %v500_v40 = vmul.f32 %v1059_v31, %v499_v2  ;;  %vm522_vm1 = vcmp.eq.f32.partialorder %v521_v0, 8.507059e+37 }
 0x1ed   :  { %v525_v33 = vsel %vm522_vm1, %v524_v1, %v520_v4  ;;  %v1105_v1 = vld [vmem:[#allocation2 + $0x240] sm:$0xff] }
 0x1ee   :  { %v501_v43 = vadd.f32 %v1059_v31, %v500_v40  ;;  %v531_v36 = vsub.f32 1.0, %v525_v33 }
 0x1f0   :  { %v505_v16 = vsel %vm504_vm12, %v1059_v31, %v501_v43  ;;  %v533_v31 = vmul.f32 %v525_v33, %v1550_v63  ;;  %v1104_v63 = vld [vmem:[#allocation2 + $0x258] sm:$0xff] }
 0x1f1   :  { %v510_v14 = vsel %vm507_vm13, %v509_v17, %v505_v16 }
 0x1f2   :  { %v528_v34 = vmul.f32 %v527_v12, %v510_v14 }
 0x1f4   :  { %v529_v2 = vadd.f32 %v528_v34, %v1548_v10  ;;  %v1103_v10 = vld [vmem:[#allocation2 + $0x270] sm:$0xff] }
 0x1f6   :  { %1060 = vtanh.f32 %v529_v2 }
 0x1fc   :  { %v1061_v40 = vpop.eup %1060 }
 0x1fd   :  { %v532_v7 = vmul.f32 %v1061_v40, %v531_v36 }
 0x1ff   :  { %v1619_v19 = vadd.f32 %v533_v31, %v532_v7  ;;  %v1111_v7 = vld [vmem:[#allocation2 + $0x298] sm:$0xff]  ;;  %v1113_v31 = vld [vmem:[#allocation2 + $0x268] sm:$0xff] }
 0x201   :  { %551 = vmatmul.f32.vlgmr.msra.gmra.mxu2 %v1619_v19  ;;  %571 = vmatmul.f32.vlgmr.msrb.gmra.mxu3 %v1619_v19 }
 0x202   :  { %591 = vmatmul.f32.vlgmr.msrb.gmra.mxu0 %v1619_v19  ;;  %791 = vmatpush.msra.mxu2 %v1235_v39  ;;  %v1106_v39 = vld [vmem:[#allocation2 + $0x228] sm:$0xff] }
 0x203   :  { %859 = vmatpush.msrb.mxu3 %v1102_v30  ;;  %879 = vmatpush.msrb.mxu0 %v1239_v41  ;;  %v1107_v41 = vld [vmem:[#allocation2 + $0x210] sm:$0xff] }
 0x204   :  { %792 = vmatpush.msra.mxu2 %v1252_v45  ;;  %v1110_v45 = vld [vmem:[#allocation2 + $0x180] sm:$0xff]  ;;  %v1114_v30 = vld [vmem:[#allocation2 + $0x250] sm:$0xff] }
 0x205   :  { %860 = vmatpush.msrb.mxu3 %v1103_v10  ;;  %880 = vmatpush.msrb.mxu0 %v1244_v42  ;;  %v1108_v42 = vld [vmem:[#allocation2 + $0x1f8] sm:$0xff] }
 0x206   :  { %793 = vmatpush.msra.mxu2 %v1254_v46  ;;  %v1754_v46 = vld [vmem:[#allocation15_spill] sm:$0xff]  ;;  %v1115_v10 = vld [vmem:[#allocation2 + $0x238] sm:$0xff] }
 0x207   :  { %861 = vmatpush.msrb.mxu3 %v1104_v63  ;;  %881 = vmatpush.msrb.mxu0 %v1248_v44  ;;  %v1109_v44 = vld [vmem:[#allocation2 + $0x1e0] sm:$0xff] }
 0x208   :  { %794 = vmatpush.msra.mxu2 %v1263_v49  ;;  %v1116_v63 = vld [vmem:[#allocation2 + $0x220] sm:$0xff] }
 0x209   :  { %862 = vmatpush.msrb.mxu3 %v1105_v1  ;;  %882 = vmatpush.msrb.mxu0 %v1256_v47 }
 0x20a   :  { %795 = vmatpush.msra.mxu2 %v1277_v52 }
 0x20b   :  { %863 = vmatpush.msrb.mxu3 %v1106_v39  ;;  %883 = vmatpush.msrb.mxu0 %v1261_v48  ;;  %v1755_v39 = vld [vmem:[#allocation16_spill] sm:$0xff] }
 0x20c   :  { %796 = vmatpush.msra.mxu2 %v1281_v54 }
 0x20d   :  { %864 = vmatpush.msrb.mxu3 %v1107_v41  ;;  %884 = vmatpush.msrb.mxu0 %v1268_v50 }
 0x20e   :  { %797 = vmatpush.msra.mxu2 %v1288_v56 }
 0x20f   :  { %865 = vmatpush.msrb.mxu3 %v1108_v42  ;;  %885 = vmatpush.msrb.mxu0 %v1273_v51  ;;  %v1756_v42 = vld [vmem:[#allocation17_spill] sm:$0xff] }
 0x210   :  { %798 = vmatpush.msra.mxu2 %v1302_v59 }
 0x211   :  { %866 = vmatpush.msrb.mxu3 %v1109_v44  ;;  %886 = vmatpush.msrb.mxu0 %v1279_v53 }
 0x212   :  { %799 = vmatpush.msra.mxu2 %v1309_v61 }
 0x213   :  { %867 = vmatpush.msrb.mxu3 %v1204_v24  ;;  %887 = vmatpush.msrb.mxu0 %v1286_v55 }
 0x214   :  { %800 = vmatpush.msra.mxu2 %v1329_v8 }
 0x215   :  { %868 = vmatpush.msrb.mxu3 %v1208_v25  ;;  %888 = vmatpush.msrb.mxu0 %v1293_v57 }
 0x216   :  { %801 = vmatpush.msra.mxu2 %v1331_v9 }
 0x217   :  { %869 = vmatpush.msrb.mxu3 %v1211_v26  ;;  %889 = vmatpush.msrb.mxu0 %v1298_v58  ;;  %v1753_v26 = vld [vmem:[#allocation14_spill] sm:$0xff] }
 0x218   :  { %802 = vmatpush.msra.mxu2 %v1343_v13 }
 0x219   :  { %870 = vmatpush.msrb.mxu3 %v1110_v45  ;;  %890 = vmatpush.msrb.mxu0 %v1304_v60 }
 0x21a   :  { %803 = vmatpush.msra.mxu2 %v1355_v23 }
 0x21b   :  { %871 = vmatpush.msrb.mxu3 %v1226_v32  ;;  %891 = vmatpush.msrb.mxu0 %v1311_v62 }
 0x21c   :  { %804 = vmatpush.msra.mxu2 %v1357_v29 }
 0x21d   :  { %872 = vmatpush.msrb.mxu3 %v1229_v35  ;;  %892 = vmatpush.msrb.mxu0 %v1743_v6 }
 0x21e   :  { %805 = vmatpush.msra.mxu2 %v1744_v11 }
 0x21f   :  { %873 = vmatpush.msrb.mxu3 %v1745_v15  ;;  %893 = vmatpush.msrb.mxu0 %v1746_v18 }
 0x220   :  { %806 = vmatpush.msra.mxu2 %v1747_v21 }
 0x221   :  { %874 = vmatpush.msrb.mxu3 %v1748_v22  ;;  %894 = vmatpush.msrb.mxu0 %v1749_v27 }
 0x27f   :  { %v592_v6 = vpop.f32.mrf.mxu0 }
 0x280   :  { %v635_v27 = vadd.f32 %v592_v6, %v1541_v28 }
 0x284   :  { %v552_v24 = vpop.f32.mrf.mxu2  ;;  %v572_v25 = vpop.f32.mrf.mxu3 }
 0x285   :  { %v595_v32 = vadd.f32 %v552_v24, %v1753_v26  ;;  %v596_v35 = vadd.f32 %v572_v25, %v1754_v46 }
 0x287   :  { %v1022_v47 = vmul.f32 -1.442695, %v595_v32  ;;  %v1023_v48 = vmul.f32 -1.442695, %v596_v35 }
 0x289   :  { %1062 = vpow2.f32 %v1022_v47 }
 0x28a   :  { %1064 = vpow2.f32 %v1023_v48 }
 0x28f   :  { %v1063_v49 = vpop.eup %1062 }
 0x290   :  { %v1065_v50 = vpop.eup %1064  ;;  %v603_v51 = vadd.f32 1.0, %v1063_v49 }
 0x291   :  { %v604_v52 = vadd.f32 1.0, %v1065_v50 }
 0x292   :  { %1066 = vrcp.f32 %v603_v51  ;;  %v616_v58 = vand.u32 2147483648, %v603_v51  ;;  %v614_v5 = vand.u32 2147483647, %v603_v51  ;;  %vm610_vm3 = vweird.f32 %v603_v51 }
 0x293   :  { %1068 = vrcp.f32 %v604_v52  ;;  %v631_v43 = vand.u32 2147483648, %v604_v52  ;;  %vm625_vm7 = vweird.f32 %v604_v52  ;;  %v629_v12 = vand.u32 2147483647, %v604_v52 }
 0x294   :  { %v617_v22 = vor.u32 1.1754944e-38, %v616_v58  ;;  %vm615_vm5 = vcmp.eq.f32.partialorder %v614_v5, 8.507059e+37 }
 0x295   :  { %v632_v34 = vor.u32 1.1754944e-38, %v631_v43  ;;  %vm630_vm9 = vcmp.eq.f32.partialorder %v629_v12, 8.507059e+37  ;;  %v1758_v43 = vld [vmem:[#allocation18_spill] sm:$0xff]  ;;  %v1759_v12 = vld [vmem:[#allocation19_spill] sm:$0xff] }
 0x298   :  { %v1067_v53 = vpop.eup %1066 }
 0x299   :  { %v1069_v54 = vpop.eup %1068  ;;  %v606_v55 = vmul.f32 %v1067_v53, %v603_v51  ;;  %vm611_vm2 = vweird.f32 %v1067_v53 }
 0x29a   :  { %v621_v56 = vmul.f32 %v1069_v54, %v604_v52  ;;  %vm612_vm4 = vmor %vm610_vm3, %vm611_vm2  ;;  %vm626_vm6 = vweird.f32 %v1069_v54 }
 0x29b   :  { %v607_v57 = vsub.f32 1.0, %v606_v55  ;;  %vm627_vm8 = vmor %vm625_vm7, %vm626_vm6 }
 0x29c   :  { %v622_v60 = vsub.f32 1.0, %v621_v56 }
 0x29d   :  { %v608_v62 = vmul.f32 %v1067_v53, %v607_v57  ;;  %v1757_v57 = vld [vmem:[#allocation23_spill] sm:$0xff] }
 0x29e   :  { %v623_v15 = vmul.f32 %v1069_v54, %v622_v60 }
 0x29f   :  { %v609_v18 = vadd.f32 %v1067_v53, %v608_v62 }
 0x2a0   :  { %v624_v20 = vadd.f32 %v1069_v54, %v623_v15 }
 0x2a1   :  { %v613_v38 = vsel %vm612_vm4, %v1067_v53, %v609_v18 }
 0x2a2   :  { %v618_v37 = vsel %vm615_vm5, %v617_v22, %v613_v38  ;;  %v628_v14 = vsel %vm627_vm8, %v1069_v54, %v624_v20 }
 0x2a3   :  { %v636_v17 = vmul.f32 %v635_v27, %v618_v37  ;;  %v633_v0 = vsel %vm630_vm9, %v632_v34, %v628_v14 }
 0x2a4   :  { %v639_v2 = vsub.f32 1.0, %v633_v0  ;;  %v641_v36 = vmul.f32 %v633_v0, %v1619_v19  ;;  %v1117_v19 = vld [vmem:[#allocation2 + $0x208] sm:$0xff] }
 0x2a5   :  { %v637_v16 = vadd.f32 %v636_v17, %v1553_v3  ;;  %v1112_v3 = vld [vmem:[#allocation2 + $0x280] sm:$0xff] }
 0x2a7   :  { %1070 = vtanh.f32 %v637_v16 }
 0x2ad   :  { %v1071_v4 = vpop.eup %1070 }
 0x2ae   :  { %v640_v33 = vmul.f32 %v1071_v4, %v639_v2 }
 0x2b0   :  { %v1668_v40 = vadd.f32 %v641_v36, %v640_v33 }
 0x2b2   :  { %659 = vmatmul.f32.vlgmr.msrb.gmra.mxu1 %v1668_v40  ;;  %679 = vmatmul.f32.vlgmr.msrb.gmra.mxu2 %v1668_v40 }
 0x2b3   :  { %699 = vmatmul.f32.vlgmr.msra.gmra.mxu3 %v1668_v40  ;;  %899 = vmatpush.msrb.mxu1 %v1111_v7 }
 0x2b5   :  { %900 = vmatpush.msrb.mxu1 %v1112_v3 }
 0x2b7   :  { %901 = vmatpush.msrb.mxu1 %v1113_v31 }
 0x2b9   :  { %902 = vmatpush.msrb.mxu1 %v1114_v30 }
 0x2bb   :  { %903 = vmatpush.msrb.mxu1 %v1115_v10 }
 0x2bd   :  { %904 = vmatpush.msrb.mxu1 %v1116_v63 }
 0x2bf   :  { %905 = vmatpush.msrb.mxu1 %v1117_v19 }
 0x2c1   :  { %906 = vmatpush.msrb.mxu1 %v1302_v59 }
 0x2c3   :  { %907 = vmatpush.msrb.mxu1 %v1309_v61 }
 0x2c5   :  { %908 = vmatpush.msrb.mxu1 %v1329_v8 }
 0x2c7   :  { %909 = vmatpush.msrb.mxu1 %v1331_v9 }
 0x2c9   :  { %910 = vmatpush.msrb.mxu1 %v1343_v13 }
 0x2cb   :  { %911 = vmatpush.msrb.mxu1 %v1355_v23 }
 0x2cd   :  { %912 = vmatpush.msrb.mxu1 %v1357_v29 }
 0x2cf   :  { %913 = vmatpush.msrb.mxu1 %v1744_v11 }
 0x2d1   :  { %914 = vmatpush.msrb.mxu1 %v1747_v21 }
 0x32f   :  { %v660_v1 = vpop.f32.mrf.mxu1 }
 0x330   :  { %v703_v41 = vadd.f32 %v660_v1, %v1755_v39 }
 0x332   :  { %v1024_v59 = vmul.f32 -1.442695, %v703_v41 }
 0x334   :  { %1072 = vpow2.f32 %v1024_v59 }
 0x335   :  { %v680_v61 = vpop.f32.mrf.mxu2 }
 0x336   :  { %v704_v8 = vadd.f32 %v680_v61, %v1756_v42  ;;  %v700_v46 = vpop.f32.mrf.mxu3 }
 0x337   :  { %v743_v51 = vadd.f32 %v700_v46, %v1541_v28 }
 0x338   :  { %v1025_v44 = vmul.f32 -1.442695, %v704_v8 }
 0x33a   :  { %v1073_v9 = vpop.eup %1072  ;;  %1074 = vpow2.f32 %v1025_v44 }
 0x33b   :  { %v711_v13 = vadd.f32 1.0, %v1073_v9 }
 0x33d   :  { %1076 = vrcp.f32 %v711_v13  ;;  %v724_v21 = vand.u32 2147483648, %v711_v13  ;;  %v722_v26 = vand.u32 2147483647, %v711_v13  ;;  %vm718_vm11 = vweird.f32 %v711_v13 }
 0x33f   :  { %v725_v48 = vor.u32 1.1754944e-38, %v724_v21  ;;  %vm723_vm13 = vcmp.eq.f32.partialorder %v722_v26, 8.507059e+37 }
 0x340   :  { %v1075_v23 = vpop.eup %1074 }
 0x341   :  { %v712_v45 = vadd.f32 1.0, %v1075_v23 }
 0x343   :  { %v1077_v29 = vpop.eup %1076  ;;  %1078 = vrcp.f32 %v712_v45  ;;  %v739_v55 = vand.u32 2147483648, %v712_v45  ;;  %v737_v56 = vand.u32 2147483647, %v712_v45  ;;  %vm733_vm15 = vweird.f32 %v712_v45 }
 0x344   :  { %v714_v11 = vmul.f32 %v1077_v29, %v711_v13  ;;  %vm719_vm10 = vweird.f32 %v1077_v29 }
 0x345   :  { %vm720_vm12 = vmor %vm718_vm11, %vm719_vm10  ;;  %v740_v5 = vor.u32 1.1754944e-38, %v739_v55  ;;  %vm738_vm1 = vcmp.eq.f32.partialorder %v737_v56, 8.507059e+37  ;;  %v114_v56 = vld [vmem:[#allocation2 + $0x390] sm:$0xff] }
 0x346   :  { %v715_v24 = vsub.f32 1.0, %v714_v11 }
 0x348   :  { %v716_v25 = vmul.f32 %v1077_v29, %v715_v24 }
 0x349   :  { %v1079_v32 = vpop.eup %1078 }
 0x34a   :  { %v729_v35 = vmul.f32 %v1079_v32, %v712_v45  ;;  %v717_v47 = vadd.f32 %v1077_v29, %v716_v25  ;;  %vm734_vm14 = vweird.f32 %v1079_v32  ;;  %v1760_v45 = vld [vmem:[#allocation24_spill] sm:$0xff] }
 0x34b   :  { %vm735_vm0 = vmor %vm733_vm15, %vm734_vm14 }
 0x34c   :  { %v730_v49 = vsub.f32 1.0, %v729_v35  ;;  %v721_v50 = vsel %vm720_vm12, %v1077_v29, %v717_v47  ;;  %v120_v47 = vld [vmem:[#allocation2 + $0x420] sm:$0xff] }
 0x34d   :  { %v726_v52 = vsel %vm723_vm13, %v725_v48, %v721_v50  ;;  %967 = vmatpush.msrb.mxu2 %v120_v47  ;;  %v119_v48 = vld [vmem:[#allocation2 + $0x408] sm:$0xff]  ;;  %v117_v50 = vld [vmem:[#allocation2 + $0x3d8] sm:$0xff] }
 0x34e   :  { %v731_v53 = vmul.f32 %v1079_v32, %v730_v49  ;;  %v744_v54 = vmul.f32 %v743_v51, %v726_v52  ;;  %v118_v49 = vld [vmem:[#allocation2 + $0x3f0] sm:$0xff]  ;;  %v116_v51 = vld [vmem:[#allocation2 + $0x3c0] sm:$0xff] }
 0x34f   :  { %968 = vmatpush.msrb.mxu2 %v119_v48 }
 0x350   :  { %v745_v58 = vadd.f32 %v744_v54, %v1757_v57  ;;  %v732_v60 = vadd.f32 %v1079_v32, %v731_v53  ;;  %v115_v53 = vld [vmem:[#allocation2 + $0x3a8] sm:$0xff]  ;;  %v1761_v54 = vld [vmem:[#allocation21_spill] sm:$0xff] }
 0x351   :  { %969 = vmatpush.msrb.mxu2 %v118_v49 }
 0x352   :  { %1080 = vtanh.f32 %v745_v58  ;;  %v736_v62 = vsel %vm735_vm0, %v1079_v32, %v732_v60  ;;  %v113_v58 = vld [vmem:[#allocation2 + $0x378] sm:$0xff]  ;;  %v112_v60 = vld [vmem:[#allocation2 + $0x360] sm:$0xff] }
 0x353   :  { %v741_v6 = vsel %vm738_vm1, %v740_v5, %v736_v62  ;;  %970 = vmatpush.msrb.mxu2 %v117_v50  ;;  %v111_v5 = vld [vmem:[#allocation2 + $0x348] sm:$0xff] }
 0x354   :  { %v747_v15 = vsub.f32 1.0, %v741_v6  ;;  %v749_v27 = vmul.f32 %v741_v6, %v1668_v40  ;;  %v1762_v6 = vld [vmem:[#allocation20_spill] sm:$0xff] }
 0x355   :  { %971 = vmatpush.msrb.mxu2 %v116_v51 }
 0x357   :  { %972 = vmatpush.msrb.mxu2 %v115_v53 }
 0x358   :  { %v1081_v18 = vpop.eup %1080 }
 0x359   :  { %v748_v22 = vmul.f32 %v1081_v18, %v747_v15  ;;  %973 = vmatpush.msrb.mxu2 %v114_v56  ;;  %v110_v18 = vld [vmem:[#allocation2 + $0x330] sm:$0xff] }
 0x35b   :  { %v750_v38 = vadd.f32 %v749_v27, %v748_v22  ;;  %974 = vmatpush.msrb.mxu2 %v113_v58  ;;  %v109_v27 = vld [vmem:[#allocation2 + $0x318] sm:$0xff] }
 0x35d   :  { %767 = vmatmul.f32.vlgmr.msra.gmra.mxu0 %v750_v38  ;;  %787 = vmatmul.f32.vlgmr.msra.gmra.mxu1 %v750_v38 }
 0x35e   :  { %807 = vmatmul.f32.vlgmr.msra.gmra.mxu2 %v750_v38 }
 0x35f   :  { %975 = vmatpush.msrb.mxu2 %v112_v60 }
 0x361   :  { %976 = vmatpush.msrb.mxu2 %v111_v5 }
 0x363   :  { %977 = vmatpush.msrb.mxu2 %v110_v18 }
 0x365   :  { %978 = vmatpush.msrb.mxu2 %v109_v27 }
 0x3da   :  { %v768_v37 = vpop.f32.mrf.mxu0  ;;  %v788_v20 = vpop.f32.mrf.mxu1 }
 0x3db   :  { %v811_v17 = vadd.f32 %v768_v37, %v1758_v43  ;;  %v812_v16 = vadd.f32 %v788_v20, %v1759_v12  ;;  %v108_v20 = vld [vmem:[#allocation2 + $0x300] sm:$0xff]  ;;  %v107_v43 = vld [vmem:[#allocation2 + $0x2e8] sm:$0xff] }
 0x3dc   :  { %979 = vmatpush.msrb.mxu2 %v108_v20 }
 0x3dd   :  { %v1026_v14 = vmul.f32 -1.442695, %v811_v17  ;;  %v1027_v34 = vmul.f32 -1.442695, %v812_v16  ;;  %v106_v17 = vld [vmem:[#allocation2 + $0x2d0] sm:$0xff] }
 0x3de   :  { %980 = vmatpush.msrb.mxu2 %v107_v43 }
 0x3df   :  { %1082 = vpow2.f32 %v1026_v14  ;;  %v105_v14 = vld [vmem:[#allocation2 + $0x2b8] sm:$0xff] }
 0x3e0   :  { %1084 = vpow2.f32 %v1027_v34  ;;  %981 = vmatpush.msrb.mxu2 %v106_v17 }
 0x3e1   :  { %v808_v39 = vpop.f32.mrf.mxu2 }
 0x3e2   :  { %v851_v42 = vadd.f32 %v808_v39, %v1541_v28  ;;  %982 = vmatpush.msrb.mxu2 %v105_v14 }
 0x3e5   :  { %v1083_v0 = vpop.eup %1082 }
 0x3e6   :  { %v1085_v2 = vpop.eup %1084  ;;  %v819_v4 = vadd.f32 1.0, %v1083_v0 }
 0x3e7   :  { %v820_v33 = vadd.f32 1.0, %v1085_v2 }
 0x3e8   :  { %1086 = vrcp.f32 %v819_v4  ;;  %v832_v10 = vand.u32 2147483648, %v819_v4  ;;  %v830_v19 = vand.u32 2147483647, %v819_v4  ;;  %vm826_vm3 = vweird.f32 %v819_v4 }
 0x3e9   :  { %1088 = vrcp.f32 %v820_v33  ;;  %v847_v13 = vand.u32 2147483648, %v820_v33  ;;  %vm841_vm7 = vweird.f32 %v820_v33  ;;  %v845_v23 = vand.u32 2147483647, %v820_v33 }
 0x3ea   :  { %v833_v59 = vor.u32 1.1754944e-38, %v832_v10  ;;  %vm831_vm5 = vcmp.eq.f32.partialorder %v830_v19, 8.507059e+37 }
 0x3eb   :  { %v848_v24 = vor.u32 1.1754944e-38, %v847_v13  ;;  %vm846_vm9 = vcmp.eq.f32.partialorder %v845_v23, 8.507059e+37 }
 0x3ee   :  { %v1087_v36 = vpop.eup %1086 }
 0x3ef   :  { %v1089_v40 = vpop.eup %1088  ;;  %v822_v7 = vmul.f32 %v1087_v36, %v819_v4  ;;  %vm827_vm2 = vweird.f32 %v1087_v36 }
 0x3f0   :  { %v837_v3 = vmul.f32 %v1089_v40, %v820_v33  ;;  %vm828_vm4 = vmor %vm826_vm3, %vm827_vm2  ;;  %vm842_vm6 = vweird.f32 %v1089_v40  ;;  %vm987_vm2 = vcmask 31744  }
 0x3f1   :  { %v823_v31 = vsub.f32 1.0, %v822_v7  ;;  %vm843_vm8 = vmor %vm841_vm7, %vm842_vm6 }
 0x3f2   :  { %v838_v30 = vsub.f32 1.0, %v837_v3 }
 0x3f3   :  { %v824_v63 = vmul.f32 %v1087_v36, %v823_v31 }
 0x3f4   :  { %v839_v1 = vmul.f32 %v1089_v40, %v838_v30 }
 0x3f5   :  { %v825_v41 = vadd.f32 %v1087_v36, %v824_v63 }
 0x3f6   :  { %v840_v44 = vadd.f32 %v1089_v40, %v839_v1 }
 0x3f7   :  { %v829_v61 = vsel %vm828_vm4, %v1087_v36, %v825_v41 }
 0x3f8   :  { %v834_v8 = vsel %vm831_vm5, %v833_v59, %v829_v61  ;;  %v844_v11 = vsel %vm843_vm8, %v1089_v40, %v840_v44  ;;  %v1763_v59 = vld [vmem:[#allocation22_spill] sm:$0xff]  ;;  %v1764_v61 = vld [vmem:[#allocation7_spill] sm:$0xff] }
 0x3f9   :  { %v852_v9 = vmul.f32 %v851_v42, %v834_v8  ;;  %v849_v21 = vsel %vm846_vm9, %v848_v24, %v844_v11  ;;  %v317_v42 = vadd.f32 %v1764_v61, %v1763_v59 }
 0x3fa   :  { %v855_v25 = vsub.f32 1.0, %v849_v21  ;;  %v857_v46 = vmul.f32 %v849_v21, %v750_v38 }
 0x3fb   :  { %v853_v29 = vadd.f32 %v852_v9, %v1760_v45 }
 0x3fd   :  { %1090 = vtanh.f32 %v853_v29 }
 0x403   :  { %v1091_v26 = vpop.eup %1090 }
 0x404   :  { %v856_v32 = vmul.f32 %v1091_v26, %v855_v25  ;;  %v121_v26 = vld [vmem:[#allocation2 + $0x438] ss:$0 sm:$0xff] }
 0x406   :  { %v1691_v35 = vadd.f32 %v857_v46, %v856_v32 }
 0x408   :  { %875 = vmatmul.f32.vlgmr.msrb.gmra.mxu3 %v1691_v35  ;;  %895 = vmatmul.f32.vlgmr.msrb.gmra.mxu0 %v1691_v35 }
 0x409   :  { %915 = vmatmul.f32.vlgmr.msrb.gmra.mxu1 %v1691_v35 }
 0x485   :  { %v896_v52 = vpop.f32.mrf.mxu0 }
 0x486   :  { %v920_v55 = vadd.f32 %v896_v52, %v1761_v54  ;;  %v916_v30 = vpop.f32.mrf.mxu1 }
 0x487   :  { %v959_v19 = vadd.f32 %v916_v30, %v1541_v28 }
 0x488   :  { %v1029_v57 = vmul.f32 -1.442695, %v920_v55 }
 0x48a   :  { %1092 = vpow2.f32 %v1029_v57 }
 0x48b   :  { %v876_v62 = vpop.f32.mrf.mxu3 }
 0x48c   :  { %v919_v15 = vadd.f32 %v876_v62, %v1762_v6 }
 0x48e   :  { %v1028_v22 = vmul.f32 -1.442695, %v919_v15 }
 0x490   :  { %v1093_v38 = vpop.eup %1092  ;;  %1094 = vpow2.f32 %v1028_v22 }
 0x491   :  { %v928_v37 = vadd.f32 1.0, %v1093_v38 }
 0x493   :  { %1096 = vrcp.f32 %v928_v37  ;;  %v955_v8 = vand.u32 2147483648, %v928_v37  ;;  %vm949_vm15 = vweird.f32 %v928_v37  ;;  %v953_v9 = vand.u32 2147483647, %v928_v37 }
 0x495   :  { %v956_v45 = vor.u32 1.1754944e-38, %v955_v8  ;;  %vm954_vm1 = vcmp.eq.f32.partialorder %v953_v9, 8.507059e+37 }
 0x496   :  { %v1095_v12 = vpop.eup %1094 }
 0x497   :  { %v927_v16 = vadd.f32 1.0, %v1095_v12 }
 0x499   :  { %1098 = vrcp.f32 %v927_v16  ;;  %v1097_v34 = vpop.eup %1096  ;;  %v940_v40 = vand.u32 2147483648, %v927_v16  ;;  %v938_v3 = vand.u32 2147483647, %v927_v16  ;;  %vm934_vm11 = vweird.f32 %v927_v16 }
 0x49a   :  { %v945_v0 = vmul.f32 %v1097_v34, %v928_v37  ;;  %vm950_vm14 = vweird.f32 %v1097_v34 }
 0x49b   :  { %v941_v63 = vor.u32 1.1754944e-38, %v940_v40  ;;  %vm939_vm13 = vcmp.eq.f32.partialorder %v938_v3, 8.507059e+37  ;;  %vm951_vm0 = vmor %vm949_vm15, %vm950_vm14 }
 0x49c   :  { %v946_v33 = vsub.f32 1.0, %v945_v0 }
 0x49e   :  { %v947_v31 = vmul.f32 %v1097_v34, %v946_v33 }
 0x49f   :  { %v1099_v2 = vpop.eup %1098 }
 0x4a0   :  { %v930_v4 = vmul.f32 %v1099_v2, %v927_v16  ;;  %vm935_vm10 = vweird.f32 %v1099_v2  ;;  %v948_v41 = vadd.f32 %v1097_v34, %v947_v31 }
 0x4a1   :  { %vm936_vm12 = vmor %vm934_vm11, %vm935_vm10 }
 0x4a2   :  { %v931_v36 = vsub.f32 1.0, %v930_v4  ;;  %v952_v23 = vsel %vm951_vm0, %v1097_v34, %v948_v41 }
 0x4a3   :  { %v957_v29 = vsel %vm954_vm1, %v956_v45, %v952_v23 }
 0x4a4   :  { %v932_v7 = vmul.f32 %v1099_v2, %v931_v36  ;;  %v963_v28 = vsub.f32 1.0, %v957_v29  ;;  %v965_v21 = vmul.f32 %v957_v29, %v1691_v35 }
 0x4a6   :  { %v933_v10 = vadd.f32 %v1099_v2, %v932_v7 }
 0x4a8   :  { %v937_v1 = vsel %vm936_vm12, %v1099_v2, %v933_v10 }
 0x4a9   :  { %v942_v39 = vsel %vm939_vm13, %v941_v63, %v937_v1 }
 0x4aa   :  { %v960_v44 = vmul.f32 %v959_v19, %v942_v39 }
 0x4ac   :  { %v961_v13 = vadd.f32 %v960_v44, %v317_v42 }
 0x4ae   :  { %1100 = vtanh.f32 %v961_v13 }
 0x4b4   :  { %v1101_v11 = vpop.eup %1100 }
 0x4b5   :  { %v964_v24 = vmul.f32 %v1101_v11, %v963_v28 }
 0x4b7   :  { %v966_v25 = vadd.f32 %v965_v21, %v964_v24 }
 0x4b9   :  { %983 = vmatmul.f32.vlgmr.msrb.gmra.mxu2 %v966_v25 }
 0x53c   :  { %v984_v32 = vpop.f32.mrf.mxu2 }
 0x53d   :  { %v985_v46 = vadd.f32 %v984_v32, %v121_v26 }
 0x53f   :  { %988 = vst.msk [vmem:[%s1707_s2] sm:$0xff] %vm987_vm2, %v985_v46 }
 0x540   :  { %993 = vsyncpa [#allocation3], 1 }

</bundles_post_ra>
